<compile_context>
chip_gen: v5e
topology: v5e:2x2
jax: 0.10.0
libtpu: 0.0.40
codegen_flags: <defaults>
</compile_context>

<pallas_src>
import jax
import jax.numpy as jnp
from jax.experimental import pallas as pl
from jax.experimental.pallas import tpu as pltpu


# ----------------------------------------------------------------------------
# Static layer table (ConvTranspose1d layers already expressed as Conv1d)
#   (C_in, C_out, K, stride, pad, L_in, activation)
# ----------------------------------------------------------------------------
_LAYERS = (
    (1,  8,  5, 2, 2, 128, "relu"),      # Conv1d(1, 8, 5, s=2, p=2)
    (8,  16, 3, 2, 1, 64,  "relu"),      # Conv1d(8, 16, 3, s=2, p=1)
    (16, 32, 3, 2, 1, 32,  "relu"),      # Conv1d(16, 32, 3, s=2, p=1)
    (32, 64, 3, 2, 1, 16,  "relu"),      # Conv1d(32, 64, 3, s=2, p=1)
    (64, 32, 3, 1, 1, 8,   "relu"),      # ConvT(64, 32) == Conv1d(p = K-1-1)
    (32, 16, 3, 1, 1, 8,   "relu"),
    (16, 8,  3, 1, 1, 8,   "relu"),
    (8,  1,  3, 1, 1, 8,   "sigmoid"),
)
_N_LAYERS = len(_LAYERS)


# ----------------------------------------------------------------------------
# Fused Pallas kernel: runs the entire autoencoder for one batch element.
# Arg order: x_ref, (w, b) x 8, out_ref, then 8 VMEM scratch activation bufs.
# ----------------------------------------------------------------------------
def _fused_autoencoder_kernel(*refs):
    x_ref = refs[0]                              # (1, 128)  (batch dim squeezed)
    wb_refs = refs[1:1 + 2 * _N_LAYERS]          # w_i: (K, O, C), b_i: (O, 1)
    o_ref = refs[1 + 2 * _N_LAYERS]              # (1, 8)
    act_bufs = refs[2 + 2 * _N_LAYERS:]          # padded activations, VMEM

    # Zero the padded activation buffers: pad columns must read as 0.
    for buf in act_bufs:
        buf[...] = jnp.zeros_like(buf)

    # Stage this batch element's input into the padded layer-1 buffer.
    p0, l0 = _LAYERS[0][4], _LAYERS[0][5]
    act_bufs[0][:, pl.ds(p0, l0)] = x_ref[...]

    for i, (C, O, K, s, p, L_in, act) in enumerate(_LAYERS):
        w_ref = wb_refs[2 * i]                   # (K, O, C)
        b_ref = wb_refs[2 * i + 1]               # (O, 1)
        a_ref = act_bufs[i]                      # (C, L_in + 2p), zero-padded
        L_full = L_in + 2 * p - K + 1            # stride-1 conv output length
        L_out = (L_in + 2 * p - K) // s + 1      # PyTorch Conv1d output length

        # K-tap on-chip convolution over contiguous slices (no HBM im2col).
        acc = jnp.zeros((O, L_full), jnp.float32)
        for k in range(K):
            tap = a_ref[:, pl.ds(k, L_full)]     # (C, L_full)
            if C == 1:
                # degenerate contraction -> cheap VPU broadcast-multiply
                acc = acc + w_ref[k] * tap       # (O,1) * (1,L_full)
            else:
                acc = acc + jnp.dot(w_ref[k], tap,
                                    preferred_element_type=jnp.float32)

        if s == 2:
            # Even-index select via a 0/1 matmul (L_full == 2 * L_out here);
            # keeps everything on the MXU and avoids strided memory access.
            rows = jax.lax.broadcasted_iota(jnp.int32, (L_full, L_out), 0)
            cols = jax.lax.broadcasted_iota(jnp.int32, (L_full, L_out), 1)
            sel = (rows == 2 * cols).astype(jnp.float32)
            acc = jnp.dot(acc, sel, preferred_element_type=jnp.float32)

        acc = acc + b_ref[...]                   # (O, 1) broadcast over lanes
        if act == "sigmoid":
            acc = jax.nn.sigmoid(acc)
        else:
            acc = jnp.maximum(acc, 0.0)

        if i + 1 < _N_LAYERS:
            # Write into the interior of the next layer's padded buffer.
            p_next = _LAYERS[i + 1][4]
            act_bufs[i + 1][:, pl.ds(p_next, L_out)] = acc
        else:
            o_ref[...] = acc.astype(o_ref.dtype)


# ----------------------------------------------------------------------------
# Wrapper: one pallas_call for the whole forward pass.
# ----------------------------------------------------------------------------
def _const_map(ndim):
    return lambda n: (0,) * ndim


def cnn1d_autoencoder(packed_params, x):
    """packed_params: tuple of 8 (w:(K,O,C), b:(O,1)); x: (N, 1, 128) fp32."""
    N, C_in, L = x.shape
    assert (C_in, L) == (_LAYERS[0][0], _LAYERS[0][5])

    flat = []
    for w, b in packed_params:
        flat.extend((w, b))

    C_f, O_f, K_f, s_f, p_f, L_f, _ = _LAYERS[-1]
    L_final = (L_f + 2 * p_f - K_f) // s_f + 1
    O_final = O_f

    in_specs = [pl.BlockSpec((None, C_in, L), lambda n: (n, 0, 0))]      # x
    in_specs += [pl.BlockSpec(a.shape, _const_map(a.ndim)) for a in flat]  # resident

    scratch = [pltpu.VMEM((C, L_in + 2 * p), jnp.float32)
               for (C, O, K, s, p, L_in, act) in _LAYERS]

    return pl.pallas_call(
        _fused_autoencoder_kernel,
        out_shape=jax.ShapeDtypeStruct((N, O_final, L_final), jnp.float32),
        grid_spec=pltpu.PrefetchScalarGridSpec(
            num_scalar_prefetch=0,
            grid=(N,),
            in_specs=in_specs,
            out_specs=pl.BlockSpec((None, O_final, L_final),
                                   lambda n: (n, 0, 0)),
            scratch_shapes=scratch,
        ),
        compiler_params=pltpu.CompilerParams(
            dimension_semantics=("parallel",)),   # both v7x TCs split the batch
    )(x, *flat)


# ----------------------------------------------------------------------------
# Deterministic parameter init (PyTorch default uniform(-1/sqrt(fan), ...))
# ----------------------------------------------------------------------------
def _init_conv(key, c_in, c_out, k):
    kw, kb = jax.random.split(key)
    bound = 1.0 / (c_in * k) ** 0.5
    W = jax.random.uniform(kw, (c_out, c_in, k), jnp.float32, -bound, bound)
    b = jax.random.uniform(kb, (c_out,), jnp.float32, -bound, bound)
    return W, b


def _init_convT(key, c_in, c_out, k):
    kw, kb = jax.random.split(key)
    bound = 1.0 / (c_out * k) ** 0.5
    W = jax.random.uniform(kw, (c_in, c_out, k), jnp.float32, -bound, bound)
    b = jax.random.uniform(kb, (c_out,), jnp.float32, -bound, bound)
    return W, b


def init_params(key):
    ks = jax.random.split(key, 8)
    enc = [_init_conv(ks[0], 1, 8, 5), _init_conv(ks[1], 8, 16, 3),
           _init_conv(ks[2], 16, 32, 3), _init_conv(ks[3], 32, 64, 3)]
    dec = [_init_convT(ks[4], 64, 32, 3), _init_convT(ks[5], 32, 16, 3),
           _init_convT(ks[6], 16, 8, 3), _init_convT(ks[7], 8, 1, 3)]
    return enc, dec


def pack_params(params):
    """PyTorch-layout params -> kernel layout: weights (K, O, C), bias (O, 1).
    ConvTranspose1d layers are folded into equivalent Conv1d weights HERE,
    once, outside the jitted forward (perf-review item)."""
    enc, dec = params
    packed = []
    for W, b in enc:                                    # W: (O, C, K)
        packed.append((jnp.transpose(W, (2, 0, 1)), b.reshape(-1, 1)))
    for W, b in dec:                                    # W: (C_in, C_out, K)
        W_eq = jnp.flip(W, axis=2).transpose(1, 0, 2)   # -> (C_out, C_in, K)
        packed.append((jnp.transpose(W_eq, (2, 0, 1)), b.reshape(-1, 1)))
    return tuple(packed)


# ----------------------------------------------------------------------------
# Plain-XLA reference (for numerical validation only)
# ----------------------------------------------------------------------------
def _ref_forward(params, x):
    enc, dec = params

    def conv(x, W, b, stride, pad):
        y = jax.lax.conv_general_dilated(
            x, W, window_strides=(stride,), padding=[(pad, pad)],
            dimension_numbers=("NCH", "OIH", "NCH"),
            precision=jax.lax.Precision.HIGHEST)
        return y + b[None, :, None]

    x = jnp.maximum(conv(x, *enc[0], 2, 2), 0.0)
    for W, b in enc[1:]:
        x = jnp.maximum(conv(x, W, b, 2, 1), 0.0)
    for i, (W, b) in enumerate(dec):
        W_eq = jnp.flip(W, axis=2).transpose(1, 0, 2)   # ConvT(s=1,p=1) == Conv
        x = conv(x, W_eq, b, 1, 1)
        x = jnp.maximum(x, 0.0) if i < len(dec) - 1 else jax.nn.sigmoid(x)
    return x


if __name__ == "__main__":
    key = jax.random.PRNGKey(0)
    k_params, k_x = jax.random.split(key)

    params = init_params(k_params)
    packed = pack_params(params)                        # once, outside jit
    x = jax.random.normal(k_x, (2, 1, 128), dtype=jnp.float32)  # (N, C=1, L=128)

    fwd = jax.jit(cnn1d_autoencoder)
    y = jax.block_until_ready(fwd(packed, x))

    assert y.shape == (2, 1, 8), y.shape                # L/16, matching PyTorch
    assert bool(jnp.all(jnp.isfinite(y)))
    assert bool(jnp.all((y >= 0.0) & (y <= 1.0)))       # sigmoid output range

    # Cross-check against the plain-XLA reference (loose tol: MXU f32 passes).
    y_ref = jax.jit(_ref_forward)(params, x)
    assert bool(jnp.allclose(y, y_ref, atol=3e-2, rtol=3e-2)), float(
        jnp.max(jnp.abs(y - y_ref)))

    print("KERNEL_OK")
</pallas_src>

<mosaic_0001>
module attributes {stable_mosaic.version = 11 : i64} {
  func.func @_fused_autoencoder_kernel(%arg0: i32, %arg1: memref<1x1x128xf32, #tpu.memory_space<vmem>>, %arg2: memref<5x8x1xf32, #tpu.memory_space<vmem>>, %arg3: memref<8x1xf32, #tpu.memory_space<vmem>>, %arg4: memref<3x16x8xf32, #tpu.memory_space<vmem>>, %arg5: memref<16x1xf32, #tpu.memory_space<vmem>>, %arg6: memref<3x32x16xf32, #tpu.memory_space<vmem>>, %arg7: memref<32x1xf32, #tpu.memory_space<vmem>>, %arg8: memref<3x64x32xf32, #tpu.memory_space<vmem>>, %arg9: memref<64x1xf32, #tpu.memory_space<vmem>>, %arg10: memref<3x32x64xf32, #tpu.memory_space<vmem>>, %arg11: memref<32x1xf32, #tpu.memory_space<vmem>>, %arg12: memref<3x16x32xf32, #tpu.memory_space<vmem>>, %arg13: memref<16x1xf32, #tpu.memory_space<vmem>>, %arg14: memref<3x8x16xf32, #tpu.memory_space<vmem>>, %arg15: memref<8x1xf32, #tpu.memory_space<vmem>>, %arg16: memref<3x1x8xf32, #tpu.memory_space<vmem>>, %arg17: memref<1x1xf32, #tpu.memory_space<vmem>>, %arg18: memref<1x1x8xf32, #tpu.memory_space<vmem>>, %arg19: memref<1x132xf32, #tpu.memory_space<vmem>>, %arg20: memref<8x66xf32, #tpu.memory_space<vmem>>, %arg21: memref<16x34xf32, #tpu.memory_space<vmem>>, %arg22: memref<32x18xf32, #tpu.memory_space<vmem>>, %arg23: memref<64x10xf32, #tpu.memory_space<vmem>>, %arg24: memref<32x10xf32, #tpu.memory_space<vmem>>, %arg25: memref<16x10xf32, #tpu.memory_space<vmem>>, %arg26: memref<8x10xf32, #tpu.memory_space<vmem>>) attributes {dimension_semantics = [#tpu.dimension_semantics<parallel>], iteration_bounds = array<i64: 2>, scalar_prefetch = 0 : i64, scratch_operands = 8 : i64, tpu.core_type = #tpu.core_type<tc>, window_params = [{transform_indices = @transform_0, window_bounds = array<i64: 1, 1, 128>}, {pipeline_mode = #tpu.pipeline_mode<synchronous>, transform_indices = @transform_1, window_bounds = array<i64: 5, 8, 1>}, {pipeline_mode = #tpu.pipeline_mode<synchronous>, transform_indices = @transform_2, window_bounds = array<i64: 8, 1>}, {pipeline_mode = #tpu.pipeline_mode<synchronous>, transform_indices = @transform_3, window_bounds = array<i64: 3, 16, 8>}, {pipeline_mode = #tpu.pipeline_mode<synchronous>, transform_indices = @transform_4, window_bounds = array<i64: 16, 1>}, {pipeline_mode = #tpu.pipeline_mode<synchronous>, transform_indices = @transform_5, window_bounds = array<i64: 3, 32, 16>}, {pipeline_mode = #tpu.pipeline_mode<synchronous>, transform_indices = @transform_6, window_bounds = array<i64: 32, 1>}, {pipeline_mode = #tpu.pipeline_mode<synchronous>, transform_indices = @transform_7, window_bounds = array<i64: 3, 64, 32>}, {pipeline_mode = #tpu.pipeline_mode<synchronous>, transform_indices = @transform_8, window_bounds = array<i64: 64, 1>}, {pipeline_mode = #tpu.pipeline_mode<synchronous>, transform_indices = @transform_9, window_bounds = array<i64: 3, 32, 64>}, {pipeline_mode = #tpu.pipeline_mode<synchronous>, transform_indices = @transform_10, window_bounds = array<i64: 32, 1>}, {pipeline_mode = #tpu.pipeline_mode<synchronous>, transform_indices = @transform_11, window_bounds = array<i64: 3, 16, 32>}, {pipeline_mode = #tpu.pipeline_mode<synchronous>, transform_indices = @transform_12, window_bounds = array<i64: 16, 1>}, {pipeline_mode = #tpu.pipeline_mode<synchronous>, transform_indices = @transform_13, window_bounds = array<i64: 3, 8, 16>}, {pipeline_mode = #tpu.pipeline_mode<synchronous>, transform_indices = @transform_14, window_bounds = array<i64: 8, 1>}, {pipeline_mode = #tpu.pipeline_mode<synchronous>, transform_indices = @transform_15, window_bounds = array<i64: 3, 1, 8>}, {pipeline_mode = #tpu.pipeline_mode<synchronous>, transform_indices = @transform_16, window_bounds = array<i64: 1, 1>}, {transform_indices = @transform_17, window_bounds = array<i64: 1, 1, 8>}]} {
    %cst = arith.constant 0.000000e+00 : f32
    %0 = vector.broadcast %cst : f32 to vector<1x132xf32>
    %c0 = arith.constant 0 : index
    %c0_0 = arith.constant 0 : index
    %1 = vector.load %arg19[%c0, %c0_0] : memref<1x132xf32, #tpu.memory_space<vmem>>, vector<1x132xf32>
    tpu.vector_store %arg19[%c0, %c0_0], %0 {strides = array<i32>} : memref<1x132xf32, #tpu.memory_space<vmem>>, vector<1x132xf32>,
    %cst_1 = arith.constant 0.000000e+00 : f32
    %2 = vector.broadcast %cst_1 : f32 to vector<8x66xf32>
    %c0_2 = arith.constant 0 : index
    %c0_3 = arith.constant 0 : index
    %3 = vector.load %arg20[%c0_2, %c0_3] : memref<8x66xf32, #tpu.memory_space<vmem>>, vector<8x66xf32>
    tpu.vector_store %arg20[%c0_2, %c0_3], %2 {strides = array<i32>} : memref<8x66xf32, #tpu.memory_space<vmem>>, vector<8x66xf32>,
    %cst_4 = arith.constant 0.000000e+00 : f32
    %4 = vector.broadcast %cst_4 : f32 to vector<16x34xf32>
    %c0_5 = arith.constant 0 : index
    %c0_6 = arith.constant 0 : index
    %5 = vector.load %arg21[%c0_5, %c0_6] : memref<16x34xf32, #tpu.memory_space<vmem>>, vector<16x34xf32>
    tpu.vector_store %arg21[%c0_5, %c0_6], %4 {strides = array<i32>} : memref<16x34xf32, #tpu.memory_space<vmem>>, vector<16x34xf32>,
    %cst_7 = arith.constant 0.000000e+00 : f32
    %6 = vector.broadcast %cst_7 : f32 to vector<32x18xf32>
    %c0_8 = arith.constant 0 : index
    %c0_9 = arith.constant 0 : index
    %7 = vector.load %arg22[%c0_8, %c0_9] : memref<32x18xf32, #tpu.memory_space<vmem>>, vector<32x18xf32>
    tpu.vector_store %arg22[%c0_8, %c0_9], %6 {strides = array<i32>} : memref<32x18xf32, #tpu.memory_space<vmem>>, vector<32x18xf32>,
    %cst_10 = arith.constant 0.000000e+00 : f32
    %8 = vector.broadcast %cst_10 : f32 to vector<64x10xf32>
    %c0_11 = arith.constant 0 : index
    %c0_12 = arith.constant 0 : index
    %9 = vector.load %arg23[%c0_11, %c0_12] : memref<64x10xf32, #tpu.memory_space<vmem>>, vector<64x10xf32>
    tpu.vector_store %arg23[%c0_11, %c0_12], %8 {strides = array<i32>} : memref<64x10xf32, #tpu.memory_space<vmem>>, vector<64x10xf32>,
    %cst_13 = arith.constant 0.000000e+00 : f32
    %10 = vector.broadcast %cst_13 : f32 to vector<32x10xf32>
    %c0_14 = arith.constant 0 : index
    %c0_15 = arith.constant 0 : index
    %11 = vector.load %arg24[%c0_14, %c0_15] : memref<32x10xf32, #tpu.memory_space<vmem>>, vector<32x10xf32>
    tpu.vector_store %arg24[%c0_14, %c0_15], %10 {strides = array<i32>} : memref<32x10xf32, #tpu.memory_space<vmem>>, vector<32x10xf32>,
    %cst_16 = arith.constant 0.000000e+00 : f32
    %12 = vector.broadcast %cst_16 : f32 to vector<16x10xf32>
    %c0_17 = arith.constant 0 : index
    %c0_18 = arith.constant 0 : index
    %13 = vector.load %arg25[%c0_17, %c0_18] : memref<16x10xf32, #tpu.memory_space<vmem>>, vector<16x10xf32>
    tpu.vector_store %arg25[%c0_17, %c0_18], %12 {strides = array<i32>} : memref<16x10xf32, #tpu.memory_space<vmem>>, vector<16x10xf32>,
    %cst_19 = arith.constant 0.000000e+00 : f32
    %14 = vector.broadcast %cst_19 : f32 to vector<8x10xf32>
    %c0_20 = arith.constant 0 : index
    %c0_21 = arith.constant 0 : index
    %15 = vector.load %arg26[%c0_20, %c0_21] : memref<8x10xf32, #tpu.memory_space<vmem>>, vector<8x10xf32>
    tpu.vector_store %arg26[%c0_20, %c0_21], %14 {strides = array<i32>} : memref<8x10xf32, #tpu.memory_space<vmem>>, vector<8x10xf32>,
    %c0_22 = arith.constant 0 : index
    %c0_23 = arith.constant 0 : index
    %c0_24 = arith.constant 0 : index
    %16 = vector.load %arg1[%c0_22, %c0_23, %c0_24] : memref<1x1x128xf32, #tpu.memory_space<vmem>>, vector<1x1x128xf32>
    %17 = vector.shape_cast %16 : vector<1x1x128xf32> to vector<1x128xf32>
    %c0_25 = arith.constant 0 : index
    %c2 = arith.constant 2 : index
    %18 = vector.load %arg19[%c0_25, %c2] : memref<1x132xf32, #tpu.memory_space<vmem>>, vector<1x128xf32>
    tpu.vector_store %arg19[%c0_25, %c2], %17 {strides = array<i32>} : memref<1x132xf32, #tpu.memory_space<vmem>>, vector<1x128xf32>,
    %cst_26 = arith.constant 0.000000e+00 : f32
    %19 = vector.broadcast %cst_26 : f32 to vector<8x128xf32>
    %c0_27 = arith.constant 0 : index
    %c0_28 = arith.constant 0 : index
    %20 = vector.load %arg19[%c0_27, %c0_28] : memref<1x132xf32, #tpu.memory_space<vmem>>, vector<1x128xf32>
    %c0_29 = arith.constant 0 : index
    %c0_30 = arith.constant 0 : index
    %c0_31 = arith.constant 0 : index
    %21 = vector.load %arg2[%c0_29, %c0_30, %c0_31] : memref<5x8x1xf32, #tpu.memory_space<vmem>>, vector<1x8x1xf32>
    %22 = vector.shape_cast %21 : vector<1x8x1xf32> to vector<8x1xf32>
    %23 = vector.broadcast %22 : vector<8x1xf32> to vector<8x128xf32>
    %24 = vector.broadcast %20 : vector<1x128xf32> to vector<8x128xf32>
    %25 = arith.mulf %23, %24 : vector<8x128xf32>
    %26 = arith.addf %19, %25 : vector<8x128xf32>
    %c0_32 = arith.constant 0 : index
    %c1 = arith.constant 1 : index
    %27 = vector.load %arg19[%c0_32, %c1] : memref<1x132xf32, #tpu.memory_space<vmem>>, vector<1x128xf32>
    %c1_33 = arith.constant 1 : index
    %c0_34 = arith.constant 0 : index
    %c0_35 = arith.constant 0 : index
    %28 = vector.load %arg2[%c1_33, %c0_34, %c0_35] : memref<5x8x1xf32, #tpu.memory_space<vmem>>, vector<1x8x1xf32>
    %29 = vector.shape_cast %28 : vector<1x8x1xf32> to vector<8x1xf32>
    %30 = vector.broadcast %29 : vector<8x1xf32> to vector<8x128xf32>
    %31 = vector.broadcast %27 : vector<1x128xf32> to vector<8x128xf32>
    %32 = arith.mulf %30, %31 : vector<8x128xf32>
    %33 = arith.addf %26, %32 : vector<8x128xf32>
    %c0_36 = arith.constant 0 : index
    %c2_37 = arith.constant 2 : index
    %34 = vector.load %arg19[%c0_36, %c2_37] : memref<1x132xf32, #tpu.memory_space<vmem>>, vector<1x128xf32>
    %c2_38 = arith.constant 2 : index
    %c0_39 = arith.constant 0 : index
    %c0_40 = arith.constant 0 : index
    %35 = vector.load %arg2[%c2_38, %c0_39, %c0_40] : memref<5x8x1xf32, #tpu.memory_space<vmem>>, vector<1x8x1xf32>
    %36 = vector.shape_cast %35 : vector<1x8x1xf32> to vector<8x1xf32>
    %37 = vector.broadcast %36 : vector<8x1xf32> to vector<8x128xf32>
    %38 = vector.broadcast %34 : vector<1x128xf32> to vector<8x128xf32>
    %39 = arith.mulf %37, %38 : vector<8x128xf32>
    %40 = arith.addf %33, %39 : vector<8x128xf32>
    %c0_41 = arith.constant 0 : index
    %c3 = arith.constant 3 : index
    %41 = vector.load %arg19[%c0_41, %c3] : memref<1x132xf32, #tpu.memory_space<vmem>>, vector<1x128xf32>
    %c3_42 = arith.constant 3 : index
    %c0_43 = arith.constant 0 : index
    %c0_44 = arith.constant 0 : index
    %42 = vector.load %arg2[%c3_42, %c0_43, %c0_44] : memref<5x8x1xf32, #tpu.memory_space<vmem>>, vector<1x8x1xf32>
    %43 = vector.shape_cast %42 : vector<1x8x1xf32> to vector<8x1xf32>
    %44 = vector.broadcast %43 : vector<8x1xf32> to vector<8x128xf32>
    %45 = vector.broadcast %41 : vector<1x128xf32> to vector<8x128xf32>
    %46 = arith.mulf %44, %45 : vector<8x128xf32>
    %47 = arith.addf %40, %46 : vector<8x128xf32>
    %c0_45 = arith.constant 0 : index
    %c4 = arith.constant 4 : index
    %48 = vector.load %arg19[%c0_45, %c4] : memref<1x132xf32, #tpu.memory_space<vmem>>, vector<1x128xf32>
    %c4_46 = arith.constant 4 : index
    %c0_47 = arith.constant 0 : index
    %c0_48 = arith.constant 0 : index
    %49 = vector.load %arg2[%c4_46, %c0_47, %c0_48] : memref<5x8x1xf32, #tpu.memory_space<vmem>>, vector<1x8x1xf32>
    %50 = vector.shape_cast %49 : vector<1x8x1xf32> to vector<8x1xf32>
    %51 = vector.broadcast %50 : vector<8x1xf32> to vector<8x128xf32>
    %52 = vector.broadcast %48 : vector<1x128xf32> to vector<8x128xf32>
    %53 = arith.mulf %51, %52 : vector<8x128xf32>
    %54 = arith.addf %47, %53 : vector<8x128xf32>
    %55 = tpu.iota {dimensions = array<i32: 0>} : vector<128x64xi32>
    %56 = tpu.iota {dimensions = array<i32: 1>} : vector<128x64xi32>
    %c2_i32 = arith.constant 2 : i32
    %57 = vector.broadcast %c2_i32 : i32 to vector<128x64xi32>
    %58 = arith.muli %57, %56 : vector<128x64xi32>
    %59 = arith.cmpi eq, %55, %58 : vector<128x64xi32>
    %60 = arith.extui %59 : vector<128x64xi1> to vector<128x64xi32>
    %61 = arith.sitofp %60 : vector<128x64xi32> to vector<128x64xf32>
    %cst_49 = arith.constant dense<0.000000e+00> : vector<8x64xf32>
    %62 = tpu.matmul %54, %61, %cst_49 {dimension_numbers = #tpu.dot_dimension_numbers<[1], [0], [0], [1], [0, 0, 1, 1], [], []>} : vector<8x128xf32>, vector<128x64xf32>, vector<8x64xf32> -> vector<8x64xf32>
    %c0_50 = arith.constant 0 : index
    %c0_51 = arith.constant 0 : index
    %63 = vector.load %arg3[%c0_50, %c0_51] : memref<8x1xf32, #tpu.memory_space<vmem>>, vector<8x1xf32>
    %64 = vector.broadcast %63 : vector<8x1xf32> to vector<8x64xf32>
    %65 = arith.addf %62, %64 : vector<8x64xf32>
    %cst_52 = arith.constant 0.000000e+00 : f32
    %66 = vector.broadcast %cst_52 : f32 to vector<8x64xf32>
    %67 = arith.maximumf %65, %66 : vector<8x64xf32>
    %c0_53 = arith.constant 0 : index
    %c1_54 = arith.constant 1 : index
    %68 = vector.load %arg20[%c0_53, %c1_54] : memref<8x66xf32, #tpu.memory_space<vmem>>, vector<8x64xf32>
    tpu.vector_store %arg20[%c0_53, %c1_54], %67 {strides = array<i32>} : memref<8x66xf32, #tpu.memory_space<vmem>>, vector<8x64xf32>,
    %cst_55 = arith.constant 0.000000e+00 : f32
    %69 = vector.broadcast %cst_55 : f32 to vector<16x64xf32>
    %c0_56 = arith.constant 0 : index
    %c0_57 = arith.constant 0 : index
    %70 = vector.load %arg20[%c0_56, %c0_57] : memref<8x66xf32, #tpu.memory_space<vmem>>, vector<8x64xf32>
    %c0_58 = arith.constant 0 : index
    %c0_59 = arith.constant 0 : index
    %c0_60 = arith.constant 0 : index
    %71 = vector.load %arg4[%c0_58, %c0_59, %c0_60] : memref<3x16x8xf32, #tpu.memory_space<vmem>>, vector<1x16x8xf32>
    %72 = vector.shape_cast %71 : vector<1x16x8xf32> to vector<16x8xf32>
    %cst_61 = arith.constant dense<0.000000e+00> : vector<16x64xf32>
    %73 = tpu.matmul %72, %70, %cst_61 {dimension_numbers = #tpu.dot_dimension_numbers<[1], [0], [0], [1], [0, 0, 1, 1], [], []>} : vector<16x8xf32>, vector<8x64xf32>, vector<16x64xf32> -> vector<16x64xf32>
    %74 = arith.addf %69, %73 : vector<16x64xf32>
    %c0_62 = arith.constant 0 : index
    %c1_63 = arith.constant 1 : index
    %75 = vector.load %arg20[%c0_62, %c1_63] : memref<8x66xf32, #tpu.memory_space<vmem>>, vector<8x64xf32>
    %c1_64 = arith.constant 1 : index
    %c0_65 = arith.constant 0 : index
    %c0_66 = arith.constant 0 : index
    %76 = vector.load %arg4[%c1_64, %c0_65, %c0_66] : memref<3x16x8xf32, #tpu.memory_space<vmem>>, vector<1x16x8xf32>
    %77 = vector.shape_cast %76 : vector<1x16x8xf32> to vector<16x8xf32>
    %cst_67 = arith.constant dense<0.000000e+00> : vector<16x64xf32>
    %78 = tpu.matmul %77, %75, %cst_67 {dimension_numbers = #tpu.dot_dimension_numbers<[1], [0], [0], [1], [0, 0, 1, 1], [], []>} : vector<16x8xf32>, vector<8x64xf32>, vector<16x64xf32> -> vector<16x64xf32>
    %79 = arith.addf %74, %78 : vector<16x64xf32>
    %c0_68 = arith.constant 0 : index
    %c2_69 = arith.constant 2 : index
    %80 = vector.load %arg20[%c0_68, %c2_69] : memref<8x66xf32, #tpu.memory_space<vmem>>, vector<8x64xf32>
    %c2_70 = arith.constant 2 : index
    %c0_71 = arith.constant 0 : index
    %c0_72 = arith.constant 0 : index
    %81 = vector.load %arg4[%c2_70, %c0_71, %c0_72] : memref<3x16x8xf32, #tpu.memory_space<vmem>>, vector<1x16x8xf32>
    %82 = vector.shape_cast %81 : vector<1x16x8xf32> to vector<16x8xf32>
    %cst_73 = arith.constant dense<0.000000e+00> : vector<16x64xf32>
    %83 = tpu.matmul %82, %80, %cst_73 {dimension_numbers = #tpu.dot_dimension_numbers<[1], [0], [0], [1], [0, 0, 1, 1], [], []>} : vector<16x8xf32>, vector<8x64xf32>, vector<16x64xf32> -> vector<16x64xf32>
    %84 = arith.addf %79, %83 : vector<16x64xf32>
    %85 = tpu.iota {dimensions = array<i32: 0>} : vector<64x32xi32>
    %86 = tpu.iota {dimensions = array<i32: 1>} : vector<64x32xi32>
    %c2_i32_74 = arith.constant 2 : i32
    %87 = vector.broadcast %c2_i32_74 : i32 to vector<64x32xi32>
    %88 = arith.muli %87, %86 : vector<64x32xi32>
    %89 = arith.cmpi eq, %85, %88 : vector<64x32xi32>
    %90 = arith.extui %89 : vector<64x32xi1> to vector<64x32xi32>
    %91 = arith.sitofp %90 : vector<64x32xi32> to vector<64x32xf32>
    %cst_75 = arith.constant dense<0.000000e+00> : vector<16x32xf32>
    %92 = tpu.matmul %84, %91, %cst_75 {dimension_numbers = #tpu.dot_dimension_numbers<[1], [0], [0], [1], [0, 0, 1, 1], [], []>} : vector<16x64xf32>, vector<64x32xf32>, vector<16x32xf32> -> vector<16x32xf32>
    %c0_76 = arith.constant 0 : index
    %c0_77 = arith.constant 0 : index
    %93 = vector.load %arg5[%c0_76, %c0_77] : memref<16x1xf32, #tpu.memory_space<vmem>>, vector<16x1xf32>
    %94 = vector.broadcast %93 : vector<16x1xf32> to vector<16x32xf32>
    %95 = arith.addf %92, %94 : vector<16x32xf32>
    %cst_78 = arith.constant 0.000000e+00 : f32
    %96 = vector.broadcast %cst_78 : f32 to vector<16x32xf32>
    %97 = arith.maximumf %95, %96 : vector<16x32xf32>
    %c0_79 = arith.constant 0 : index
    %c1_80 = arith.constant 1 : index
    %98 = vector.load %arg21[%c0_79, %c1_80] : memref<16x34xf32, #tpu.memory_space<vmem>>, vector<16x32xf32>
    tpu.vector_store %arg21[%c0_79, %c1_80], %97 {strides = array<i32>} : memref<16x34xf32, #tpu.memory_space<vmem>>, vector<16x32xf32>,
    %cst_81 = arith.constant 0.000000e+00 : f32
    %99 = vector.broadcast %cst_81 : f32 to vector<32x32xf32>
    %c0_82 = arith.constant 0 : index
    %c0_83 = arith.constant 0 : index
    %100 = vector.load %arg21[%c0_82, %c0_83] : memref<16x34xf32, #tpu.memory_space<vmem>>, vector<16x32xf32>
    %c0_84 = arith.constant 0 : index
    %c0_85 = arith.constant 0 : index
    %c0_86 = arith.constant 0 : index
    %101 = vector.load %arg6[%c0_84, %c0_85, %c0_86] : memref<3x32x16xf32, #tpu.memory_space<vmem>>, vector<1x32x16xf32>
    %102 = vector.shape_cast %101 : vector<1x32x16xf32> to vector<32x16xf32>
    %cst_87 = arith.constant dense<0.000000e+00> : vector<32x32xf32>
    %103 = tpu.matmul %102, %100, %cst_87 {dimension_numbers = #tpu.dot_dimension_numbers<[1], [0], [0], [1], [0, 0, 1, 1], [], []>} : vector<32x16xf32>, vector<16x32xf32>, vector<32x32xf32> -> vector<32x32xf32>
    %104 = arith.addf %99, %103 : vector<32x32xf32>
    %c0_88 = arith.constant 0 : index
    %c1_89 = arith.constant 1 : index
    %105 = vector.load %arg21[%c0_88, %c1_89] : memref<16x34xf32, #tpu.memory_space<vmem>>, vector<16x32xf32>
    %c1_90 = arith.constant 1 : index
    %c0_91 = arith.constant 0 : index
    %c0_92 = arith.constant 0 : index
    %106 = vector.load %arg6[%c1_90, %c0_91, %c0_92] : memref<3x32x16xf32, #tpu.memory_space<vmem>>, vector<1x32x16xf32>
    %107 = vector.shape_cast %106 : vector<1x32x16xf32> to vector<32x16xf32>
    %cst_93 = arith.constant dense<0.000000e+00> : vector<32x32xf32>
    %108 = tpu.matmul %107, %105, %cst_93 {dimension_numbers = #tpu.dot_dimension_numbers<[1], [0], [0], [1], [0, 0, 1, 1], [], []>} : vector<32x16xf32>, vector<16x32xf32>, vector<32x32xf32> -> vector<32x32xf32>
    %109 = arith.addf %104, %108 : vector<32x32xf32>
    %c0_94 = arith.constant 0 : index
    %c2_95 = arith.constant 2 : index
    %110 = vector.load %arg21[%c0_94, %c2_95] : memref<16x34xf32, #tpu.memory_space<vmem>>, vector<16x32xf32>
    %c2_96 = arith.constant 2 : index
    %c0_97 = arith.constant 0 : index
    %c0_98 = arith.constant 0 : index
    %111 = vector.load %arg6[%c2_96, %c0_97, %c0_98] : memref<3x32x16xf32, #tpu.memory_space<vmem>>, vector<1x32x16xf32>
    %112 = vector.shape_cast %111 : vector<1x32x16xf32> to vector<32x16xf32>
    %cst_99 = arith.constant dense<0.000000e+00> : vector<32x32xf32>
    %113 = tpu.matmul %112, %110, %cst_99 {dimension_numbers = #tpu.dot_dimension_numbers<[1], [0], [0], [1], [0, 0, 1, 1], [], []>} : vector<32x16xf32>, vector<16x32xf32>, vector<32x32xf32> -> vector<32x32xf32>
    %114 = arith.addf %109, %113 : vector<32x32xf32>
    %115 = tpu.iota {dimensions = array<i32: 0>} : vector<32x16xi32>
    %116 = tpu.iota {dimensions = array<i32: 1>} : vector<32x16xi32>
    %c2_i32_100 = arith.constant 2 : i32
    %117 = vector.broadcast %c2_i32_100 : i32 to vector<32x16xi32>
    %118 = arith.muli %117, %116 : vector<32x16xi32>
    %119 = arith.cmpi eq, %115, %118 : vector<32x16xi32>
    %120 = arith.extui %119 : vector<32x16xi1> to vector<32x16xi32>
    %121 = arith.sitofp %120 : vector<32x16xi32> to vector<32x16xf32>
    %cst_101 = arith.constant dense<0.000000e+00> : vector<32x16xf32>
    %122 = tpu.matmul %114, %121, %cst_101 {dimension_numbers = #tpu.dot_dimension_numbers<[1], [0], [0], [1], [0, 0, 1, 1], [], []>} : vector<32x32xf32>, vector<32x16xf32>, vector<32x16xf32> -> vector<32x16xf32>
    %c0_102 = arith.constant 0 : index
    %c0_103 = arith.constant 0 : index
    %123 = vector.load %arg7[%c0_102, %c0_103] : memref<32x1xf32, #tpu.memory_space<vmem>>, vector<32x1xf32>
    %124 = vector.broadcast %123 : vector<32x1xf32> to vector<32x16xf32>
    %125 = arith.addf %122, %124 : vector<32x16xf32>
    %cst_104 = arith.constant 0.000000e+00 : f32
    %126 = vector.broadcast %cst_104 : f32 to vector<32x16xf32>
    %127 = arith.maximumf %125, %126 : vector<32x16xf32>
    %c0_105 = arith.constant 0 : index
    %c1_106 = arith.constant 1 : index
    %128 = vector.load %arg22[%c0_105, %c1_106] : memref<32x18xf32, #tpu.memory_space<vmem>>, vector<32x16xf32>
    tpu.vector_store %arg22[%c0_105, %c1_106], %127 {strides = array<i32>} : memref<32x18xf32, #tpu.memory_space<vmem>>, vector<32x16xf32>,
    %cst_107 = arith.constant 0.000000e+00 : f32
    %129 = vector.broadcast %cst_107 : f32 to vector<64x16xf32>
    %c0_108 = arith.constant 0 : index
    %c0_109 = arith.constant 0 : index
    %130 = vector.load %arg22[%c0_108, %c0_109] : memref<32x18xf32, #tpu.memory_space<vmem>>, vector<32x16xf32>
    %c0_110 = arith.constant 0 : index
    %c0_111 = arith.constant 0 : index
    %c0_112 = arith.constant 0 : index
    %131 = vector.load %arg8[%c0_110, %c0_111, %c0_112] : memref<3x64x32xf32, #tpu.memory_space<vmem>>, vector<1x64x32xf32>
    %132 = vector.shape_cast %131 : vector<1x64x32xf32> to vector<64x32xf32>
    %cst_113 = arith.constant dense<0.000000e+00> : vector<64x16xf32>
    %133 = tpu.matmul %132, %130, %cst_113 {dimension_numbers = #tpu.dot_dimension_numbers<[1], [0], [0], [1], [0, 0, 1, 1], [], []>} : vector<64x32xf32>, vector<32x16xf32>, vector<64x16xf32> -> vector<64x16xf32>
    %134 = arith.addf %129, %133 : vector<64x16xf32>
    %c0_114 = arith.constant 0 : index
    %c1_115 = arith.constant 1 : index
    %135 = vector.load %arg22[%c0_114, %c1_115] : memref<32x18xf32, #tpu.memory_space<vmem>>, vector<32x16xf32>
    %c1_116 = arith.constant 1 : index
    %c0_117 = arith.constant 0 : index
    %c0_118 = arith.constant 0 : index
    %136 = vector.load %arg8[%c1_116, %c0_117, %c0_118] : memref<3x64x32xf32, #tpu.memory_space<vmem>>, vector<1x64x32xf32>
    %137 = vector.shape_cast %136 : vector<1x64x32xf32> to vector<64x32xf32>
    %cst_119 = arith.constant dense<0.000000e+00> : vector<64x16xf32>
    %138 = tpu.matmul %137, %135, %cst_119 {dimension_numbers = #tpu.dot_dimension_numbers<[1], [0], [0], [1], [0, 0, 1, 1], [], []>} : vector<64x32xf32>, vector<32x16xf32>, vector<64x16xf32> -> vector<64x16xf32>
    %139 = arith.addf %134, %138 : vector<64x16xf32>
    %c0_120 = arith.constant 0 : index
    %c2_121 = arith.constant 2 : index
    %140 = vector.load %arg22[%c0_120, %c2_121] : memref<32x18xf32, #tpu.memory_space<vmem>>, vector<32x16xf32>
    %c2_122 = arith.constant 2 : index
    %c0_123 = arith.constant 0 : index
    %c0_124 = arith.constant 0 : index
    %141 = vector.load %arg8[%c2_122, %c0_123, %c0_124] : memref<3x64x32xf32, #tpu.memory_space<vmem>>, vector<1x64x32xf32>
    %142 = vector.shape_cast %141 : vector<1x64x32xf32> to vector<64x32xf32>
    %cst_125 = arith.constant dense<0.000000e+00> : vector<64x16xf32>
    %143 = tpu.matmul %142, %140, %cst_125 {dimension_numbers = #tpu.dot_dimension_numbers<[1], [0], [0], [1], [0, 0, 1, 1], [], []>} : vector<64x32xf32>, vector<32x16xf32>, vector<64x16xf32> -> vector<64x16xf32>
    %144 = arith.addf %139, %143 : vector<64x16xf32>
    %145 = tpu.iota {dimensions = array<i32: 0>} : vector<16x8xi32>
    %146 = tpu.iota {dimensions = array<i32: 1>} : vector<16x8xi32>
    %c2_i32_126 = arith.constant 2 : i32
    %147 = vector.broadcast %c2_i32_126 : i32 to vector<16x8xi32>
    %148 = arith.muli %147, %146 : vector<16x8xi32>
    %149 = arith.cmpi eq, %145, %148 : vector<16x8xi32>
    %150 = arith.extui %149 : vector<16x8xi1> to vector<16x8xi32>
    %151 = arith.sitofp %150 : vector<16x8xi32> to vector<16x8xf32>
    %cst_127 = arith.constant dense<0.000000e+00> : vector<64x8xf32>
    %152 = tpu.matmul %144, %151, %cst_127 {dimension_numbers = #tpu.dot_dimension_numbers<[1], [0], [0], [1], [0, 0, 1, 1], [], []>} : vector<64x16xf32>, vector<16x8xf32>, vector<64x8xf32> -> vector<64x8xf32>
    %c0_128 = arith.constant 0 : index
    %c0_129 = arith.constant 0 : index
    %153 = vector.load %arg9[%c0_128, %c0_129] : memref<64x1xf32, #tpu.memory_space<vmem>>, vector<64x1xf32>
    %154 = vector.broadcast %153 : vector<64x1xf32> to vector<64x8xf32>
    %155 = arith.addf %152, %154 : vector<64x8xf32>
    %cst_130 = arith.constant 0.000000e+00 : f32
    %156 = vector.broadcast %cst_130 : f32 to vector<64x8xf32>
    %157 = arith.maximumf %155, %156 : vector<64x8xf32>
    %c0_131 = arith.constant 0 : index
    %c1_132 = arith.constant 1 : index
    %158 = vector.load %arg23[%c0_131, %c1_132] : memref<64x10xf32, #tpu.memory_space<vmem>>, vector<64x8xf32>
    tpu.vector_store %arg23[%c0_131, %c1_132], %157 {strides = array<i32>} : memref<64x10xf32, #tpu.memory_space<vmem>>, vector<64x8xf32>,
    %cst_133 = arith.constant 0.000000e+00 : f32
    %159 = vector.broadcast %cst_133 : f32 to vector<32x8xf32>
    %c0_134 = arith.constant 0 : index
    %c0_135 = arith.constant 0 : index
    %160 = vector.load %arg23[%c0_134, %c0_135] : memref<64x10xf32, #tpu.memory_space<vmem>>, vector<64x8xf32>
    %c0_136 = arith.constant 0 : index
    %c0_137 = arith.constant 0 : index
    %c0_138 = arith.constant 0 : index
    %161 = vector.load %arg10[%c0_136, %c0_137, %c0_138] : memref<3x32x64xf32, #tpu.memory_space<vmem>>, vector<1x32x64xf32>
    %162 = vector.shape_cast %161 : vector<1x32x64xf32> to vector<32x64xf32>
    %cst_139 = arith.constant dense<0.000000e+00> : vector<32x8xf32>
    %163 = tpu.matmul %162, %160, %cst_139 {dimension_numbers = #tpu.dot_dimension_numbers<[1], [0], [0], [1], [0, 0, 1, 1], [], []>} : vector<32x64xf32>, vector<64x8xf32>, vector<32x8xf32> -> vector<32x8xf32>
    %164 = arith.addf %159, %163 : vector<32x8xf32>
    %c0_140 = arith.constant 0 : index
    %c1_141 = arith.constant 1 : index
    %165 = vector.load %arg23[%c0_140, %c1_141] : memref<64x10xf32, #tpu.memory_space<vmem>>, vector<64x8xf32>
    %c1_142 = arith.constant 1 : index
    %c0_143 = arith.constant 0 : index
    %c0_144 = arith.constant 0 : index
    %166 = vector.load %arg10[%c1_142, %c0_143, %c0_144] : memref<3x32x64xf32, #tpu.memory_space<vmem>>, vector<1x32x64xf32>
    %167 = vector.shape_cast %166 : vector<1x32x64xf32> to vector<32x64xf32>
    %cst_145 = arith.constant dense<0.000000e+00> : vector<32x8xf32>
    %168 = tpu.matmul %167, %165, %cst_145 {dimension_numbers = #tpu.dot_dimension_numbers<[1], [0], [0], [1], [0, 0, 1, 1], [], []>} : vector<32x64xf32>, vector<64x8xf32>, vector<32x8xf32> -> vector<32x8xf32>
    %169 = arith.addf %164, %168 : vector<32x8xf32>
    %c0_146 = arith.constant 0 : index
    %c2_147 = arith.constant 2 : index
    %170 = vector.load %arg23[%c0_146, %c2_147] : memref<64x10xf32, #tpu.memory_space<vmem>>, vector<64x8xf32>
    %c2_148 = arith.constant 2 : index
    %c0_149 = arith.constant 0 : index
    %c0_150 = arith.constant 0 : index
    %171 = vector.load %arg10[%c2_148, %c0_149, %c0_150] : memref<3x32x64xf32, #tpu.memory_space<vmem>>, vector<1x32x64xf32>
    %172 = vector.shape_cast %171 : vector<1x32x64xf32> to vector<32x64xf32>
    %cst_151 = arith.constant dense<0.000000e+00> : vector<32x8xf32>
    %173 = tpu.matmul %172, %170, %cst_151 {dimension_numbers = #tpu.dot_dimension_numbers<[1], [0], [0], [1], [0, 0, 1, 1], [], []>} : vector<32x64xf32>, vector<64x8xf32>, vector<32x8xf32> -> vector<32x8xf32>
    %174 = arith.addf %169, %173 : vector<32x8xf32>
    %c0_152 = arith.constant 0 : index
    %c0_153 = arith.constant 0 : index
    %175 = vector.load %arg11[%c0_152, %c0_153] : memref<32x1xf32, #tpu.memory_space<vmem>>, vector<32x1xf32>
    %176 = vector.broadcast %175 : vector<32x1xf32> to vector<32x8xf32>
    %177 = arith.addf %174, %176 : vector<32x8xf32>
    %cst_154 = arith.constant 0.000000e+00 : f32
    %178 = vector.broadcast %cst_154 : f32 to vector<32x8xf32>
    %179 = arith.maximumf %177, %178 : vector<32x8xf32>
    %c0_155 = arith.constant 0 : index
    %c1_156 = arith.constant 1 : index
    %180 = vector.load %arg24[%c0_155, %c1_156] : memref<32x10xf32, #tpu.memory_space<vmem>>, vector<32x8xf32>
    tpu.vector_store %arg24[%c0_155, %c1_156], %179 {strides = array<i32>} : memref<32x10xf32, #tpu.memory_space<vmem>>, vector<32x8xf32>,
    %cst_157 = arith.constant 0.000000e+00 : f32
    %181 = vector.broadcast %cst_157 : f32 to vector<16x8xf32>
    %c0_158 = arith.constant 0 : index
    %c0_159 = arith.constant 0 : index
    %182 = vector.load %arg24[%c0_158, %c0_159] : memref<32x10xf32, #tpu.memory_space<vmem>>, vector<32x8xf32>
    %c0_160 = arith.constant 0 : index
    %c0_161 = arith.constant 0 : index
    %c0_162 = arith.constant 0 : index
    %183 = vector.load %arg12[%c0_160, %c0_161, %c0_162] : memref<3x16x32xf32, #tpu.memory_space<vmem>>, vector<1x16x32xf32>
    %184 = vector.shape_cast %183 : vector<1x16x32xf32> to vector<16x32xf32>
    %cst_163 = arith.constant dense<0.000000e+00> : vector<16x8xf32>
    %185 = tpu.matmul %184, %182, %cst_163 {dimension_numbers = #tpu.dot_dimension_numbers<[1], [0], [0], [1], [0, 0, 1, 1], [], []>} : vector<16x32xf32>, vector<32x8xf32>, vector<16x8xf32> -> vector<16x8xf32>
    %186 = arith.addf %181, %185 : vector<16x8xf32>
    %c0_164 = arith.constant 0 : index
    %c1_165 = arith.constant 1 : index
    %187 = vector.load %arg24[%c0_164, %c1_165] : memref<32x10xf32, #tpu.memory_space<vmem>>, vector<32x8xf32>
    %c1_166 = arith.constant 1 : index
    %c0_167 = arith.constant 0 : index
    %c0_168 = arith.constant 0 : index
    %188 = vector.load %arg12[%c1_166, %c0_167, %c0_168] : memref<3x16x32xf32, #tpu.memory_space<vmem>>, vector<1x16x32xf32>
    %189 = vector.shape_cast %188 : vector<1x16x32xf32> to vector<16x32xf32>
    %cst_169 = arith.constant dense<0.000000e+00> : vector<16x8xf32>
    %190 = tpu.matmul %189, %187, %cst_169 {dimension_numbers = #tpu.dot_dimension_numbers<[1], [0], [0], [1], [0, 0, 1, 1], [], []>} : vector<16x32xf32>, vector<32x8xf32>, vector<16x8xf32> -> vector<16x8xf32>
    %191 = arith.addf %186, %190 : vector<16x8xf32>
    %c0_170 = arith.constant 0 : index
    %c2_171 = arith.constant 2 : index
    %192 = vector.load %arg24[%c0_170, %c2_171] : memref<32x10xf32, #tpu.memory_space<vmem>>, vector<32x8xf32>
    %c2_172 = arith.constant 2 : index
    %c0_173 = arith.constant 0 : index
    %c0_174 = arith.constant 0 : index
    %193 = vector.load %arg12[%c2_172, %c0_173, %c0_174] : memref<3x16x32xf32, #tpu.memory_space<vmem>>, vector<1x16x32xf32>
    %194 = vector.shape_cast %193 : vector<1x16x32xf32> to vector<16x32xf32>
    %cst_175 = arith.constant dense<0.000000e+00> : vector<16x8xf32>
    %195 = tpu.matmul %194, %192, %cst_175 {dimension_numbers = #tpu.dot_dimension_numbers<[1], [0], [0], [1], [0, 0, 1, 1], [], []>} : vector<16x32xf32>, vector<32x8xf32>, vector<16x8xf32> -> vector<16x8xf32>
    %196 = arith.addf %191, %195 : vector<16x8xf32>
    %c0_176 = arith.constant 0 : index
    %c0_177 = arith.constant 0 : index
    %197 = vector.load %arg13[%c0_176, %c0_177] : memref<16x1xf32, #tpu.memory_space<vmem>>, vector<16x1xf32>
    %198 = vector.broadcast %197 : vector<16x1xf32> to vector<16x8xf32>
    %199 = arith.addf %196, %198 : vector<16x8xf32>
    %cst_178 = arith.constant 0.000000e+00 : f32
    %200 = vector.broadcast %cst_178 : f32 to vector<16x8xf32>
    %201 = arith.maximumf %199, %200 : vector<16x8xf32>
    %c0_179 = arith.constant 0 : index
    %c1_180 = arith.constant 1 : index
    %202 = vector.load %arg25[%c0_179, %c1_180] : memref<16x10xf32, #tpu.memory_space<vmem>>, vector<16x8xf32>
    tpu.vector_store %arg25[%c0_179, %c1_180], %201 {strides = array<i32>} : memref<16x10xf32, #tpu.memory_space<vmem>>, vector<16x8xf32>,
    %cst_181 = arith.constant 0.000000e+00 : f32
    %203 = vector.broadcast %cst_181 : f32 to vector<8x8xf32>
    %c0_182 = arith.constant 0 : index
    %c0_183 = arith.constant 0 : index
    %204 = vector.load %arg25[%c0_182, %c0_183] : memref<16x10xf32, #tpu.memory_space<vmem>>, vector<16x8xf32>
    %c0_184 = arith.constant 0 : index
    %c0_185 = arith.constant 0 : index
    %c0_186 = arith.constant 0 : index
    %205 = vector.load %arg14[%c0_184, %c0_185, %c0_186] : memref<3x8x16xf32, #tpu.memory_space<vmem>>, vector<1x8x16xf32>
    %206 = vector.shape_cast %205 : vector<1x8x16xf32> to vector<8x16xf32>
    %cst_187 = arith.constant dense<0.000000e+00> : vector<8x8xf32>
    %207 = tpu.matmul %206, %204, %cst_187 {dimension_numbers = #tpu.dot_dimension_numbers<[1], [0], [0], [1], [0, 0, 1, 1], [], []>} : vector<8x16xf32>, vector<16x8xf32>, vector<8x8xf32> -> vector<8x8xf32>
    %208 = arith.addf %203, %207 : vector<8x8xf32>
    %c0_188 = arith.constant 0 : index
    %c1_189 = arith.constant 1 : index
    %209 = vector.load %arg25[%c0_188, %c1_189] : memref<16x10xf32, #tpu.memory_space<vmem>>, vector<16x8xf32>
    %c1_190 = arith.constant 1 : index
    %c0_191 = arith.constant 0 : index
    %c0_192 = arith.constant 0 : index
    %210 = vector.load %arg14[%c1_190, %c0_191, %c0_192] : memref<3x8x16xf32, #tpu.memory_space<vmem>>, vector<1x8x16xf32>
    %211 = vector.shape_cast %210 : vector<1x8x16xf32> to vector<8x16xf32>
    %cst_193 = arith.constant dense<0.000000e+00> : vector<8x8xf32>
    %212 = tpu.matmul %211, %209, %cst_193 {dimension_numbers = #tpu.dot_dimension_numbers<[1], [0], [0], [1], [0, 0, 1, 1], [], []>} : vector<8x16xf32>, vector<16x8xf32>, vector<8x8xf32> -> vector<8x8xf32>
    %213 = arith.addf %208, %212 : vector<8x8xf32>
    %c0_194 = arith.constant 0 : index
    %c2_195 = arith.constant 2 : index
    %214 = vector.load %arg25[%c0_194, %c2_195] : memref<16x10xf32, #tpu.memory_space<vmem>>, vector<16x8xf32>
    %c2_196 = arith.constant 2 : index
    %c0_197 = arith.constant 0 : index
    %c0_198 = arith.constant 0 : index
    %215 = vector.load %arg14[%c2_196, %c0_197, %c0_198] : memref<3x8x16xf32, #tpu.memory_space<vmem>>, vector<1x8x16xf32>
    %216 = vector.shape_cast %215 : vector<1x8x16xf32> to vector<8x16xf32>
    %cst_199 = arith.constant dense<0.000000e+00> : vector<8x8xf32>
    %217 = tpu.matmul %216, %214, %cst_199 {dimension_numbers = #tpu.dot_dimension_numbers<[1], [0], [0], [1], [0, 0, 1, 1], [], []>} : vector<8x16xf32>, vector<16x8xf32>, vector<8x8xf32> -> vector<8x8xf32>
    %218 = arith.addf %213, %217 : vector<8x8xf32>
    %c0_200 = arith.constant 0 : index
    %c0_201 = arith.constant 0 : index
    %219 = vector.load %arg15[%c0_200, %c0_201] : memref<8x1xf32, #tpu.memory_space<vmem>>, vector<8x1xf32>
    %220 = vector.broadcast %219 : vector<8x1xf32> to vector<8x8xf32>
    %221 = arith.addf %218, %220 : vector<8x8xf32>
    %cst_202 = arith.constant 0.000000e+00 : f32
    %222 = vector.broadcast %cst_202 : f32 to vector<8x8xf32>
    %223 = arith.maximumf %221, %222 : vector<8x8xf32>
    %c0_203 = arith.constant 0 : index
    %c1_204 = arith.constant 1 : index
    %224 = vector.load %arg26[%c0_203, %c1_204] : memref<8x10xf32, #tpu.memory_space<vmem>>, vector<8x8xf32>
    tpu.vector_store %arg26[%c0_203, %c1_204], %223 {strides = array<i32>} : memref<8x10xf32, #tpu.memory_space<vmem>>, vector<8x8xf32>,
    %cst_205 = arith.constant 0.000000e+00 : f32
    %225 = vector.broadcast %cst_205 : f32 to vector<1x8xf32>
    %c0_206 = arith.constant 0 : index
    %c0_207 = arith.constant 0 : index
    %226 = vector.load %arg26[%c0_206, %c0_207] : memref<8x10xf32, #tpu.memory_space<vmem>>, vector<8x8xf32>
    %c0_208 = arith.constant 0 : index
    %c0_209 = arith.constant 0 : index
    %c0_210 = arith.constant 0 : index
    %227 = vector.load %arg16[%c0_208, %c0_209, %c0_210] : memref<3x1x8xf32, #tpu.memory_space<vmem>>, vector<1x1x8xf32>
    %228 = vector.shape_cast %227 : vector<1x1x8xf32> to vector<1x8xf32>
    %cst_211 = arith.constant dense<0.000000e+00> : vector<1x8xf32>
    %229 = tpu.matmul %228, %226, %cst_211 {dimension_numbers = #tpu.dot_dimension_numbers<[1], [0], [0], [1], [0, 0, 1, 1], [], []>} : vector<1x8xf32>, vector<8x8xf32>, vector<1x8xf32> -> vector<1x8xf32>
    %230 = arith.addf %225, %229 : vector<1x8xf32>
    %c0_212 = arith.constant 0 : index
    %c1_213 = arith.constant 1 : index
    %231 = vector.load %arg26[%c0_212, %c1_213] : memref<8x10xf32, #tpu.memory_space<vmem>>, vector<8x8xf32>
    %c1_214 = arith.constant 1 : index
    %c0_215 = arith.constant 0 : index
    %c0_216 = arith.constant 0 : index
    %232 = vector.load %arg16[%c1_214, %c0_215, %c0_216] : memref<3x1x8xf32, #tpu.memory_space<vmem>>, vector<1x1x8xf32>
    %233 = vector.shape_cast %232 : vector<1x1x8xf32> to vector<1x8xf32>
    %cst_217 = arith.constant dense<0.000000e+00> : vector<1x8xf32>
    %234 = tpu.matmul %233, %231, %cst_217 {dimension_numbers = #tpu.dot_dimension_numbers<[1], [0], [0], [1], [0, 0, 1, 1], [], []>} : vector<1x8xf32>, vector<8x8xf32>, vector<1x8xf32> -> vector<1x8xf32>
    %235 = arith.addf %230, %234 : vector<1x8xf32>
    %c0_218 = arith.constant 0 : index
    %c2_219 = arith.constant 2 : index
    %236 = vector.load %arg26[%c0_218, %c2_219] : memref<8x10xf32, #tpu.memory_space<vmem>>, vector<8x8xf32>
    %c2_220 = arith.constant 2 : index
    %c0_221 = arith.constant 0 : index
    %c0_222 = arith.constant 0 : index
    %237 = vector.load %arg16[%c2_220, %c0_221, %c0_222] : memref<3x1x8xf32, #tpu.memory_space<vmem>>, vector<1x1x8xf32>
    %238 = vector.shape_cast %237 : vector<1x1x8xf32> to vector<1x8xf32>
    %cst_223 = arith.constant dense<0.000000e+00> : vector<1x8xf32>
    %239 = tpu.matmul %238, %236, %cst_223 {dimension_numbers = #tpu.dot_dimension_numbers<[1], [0], [0], [1], [0, 0, 1, 1], [], []>} : vector<1x8xf32>, vector<8x8xf32>, vector<1x8xf32> -> vector<1x8xf32>
    %240 = arith.addf %235, %239 : vector<1x8xf32>
    %c0_224 = arith.constant 0 : index
    %c0_225 = arith.constant 0 : index
    %241 = vector.load %arg17[%c0_224, %c0_225] : memref<1x1xf32, #tpu.memory_space<vmem>>, vector<1x1xf32>
    %242 = vector.broadcast %241 : vector<1x1xf32> to vector<1x8xf32>
    %243 = arith.addf %240, %242 : vector<1x8xf32>
    %244 = arith.negf %243 : vector<1x8xf32>
    %245 = math.exp %244 : vector<1x8xf32>
    %cst_226 = arith.constant 1.000000e+00 : f32
    %246 = vector.broadcast %cst_226 : f32 to vector<1x8xf32>
    %247 = arith.addf %246, %245 : vector<1x8xf32>
    %248 = arith.divf %246, %247 : vector<1x8xf32>
    %c0_227 = arith.constant 0 : index
    %c0_228 = arith.constant 0 : index
    %c0_229 = arith.constant 0 : index
    %249 = vector.load %arg18[%c0_227, %c0_228, %c0_229] : memref<1x1x8xf32, #tpu.memory_space<vmem>>, vector<1x1x8xf32>
    %250 = vector.shape_cast %249 : vector<1x1x8xf32> to vector<1x8xf32>
    %251 = vector.shape_cast %248 : vector<1x8xf32> to vector<1x1x8xf32>
    tpu.vector_store %arg18[%c0_227, %c0_228, %c0_229], %251 {strides = array<i32>} : memref<1x1x8xf32, #tpu.memory_space<vmem>>, vector<1x1x8xf32>,
    return
  }
  func.func @transform_0(%arg0: i32) -> (i32, i32, i32) {
    %c0_i32 = arith.constant 0 : i32
    %c0_i32_0 = arith.constant 0 : i32
    %c0_i32_1 = arith.constant 0 : i32
    return %arg0, %c0_i32, %c0_i32_0 : i32, i32, i32
  }
  func.func @transform_1(%arg0: i32) -> (i32, i32, i32) {
    %c0_i32 = arith.constant 0 : i32
    %c0_i32_0 = arith.constant 0 : i32
    %c0_i32_1 = arith.constant 0 : i32
    %c0_i32_2 = arith.constant 0 : i32
    return %c0_i32, %c0_i32_0, %c0_i32_1 : i32, i32, i32
  }
  func.func @transform_2(%arg0: i32) -> (i32, i32) {
    %c0_i32 = arith.constant 0 : i32
    %c0_i32_0 = arith.constant 0 : i32
    %c0_i32_1 = arith.constant 0 : i32
    return %c0_i32, %c0_i32_0 : i32, i32
  }
  func.func @transform_3(%arg0: i32) -> (i32, i32, i32) {
    %c0_i32 = arith.constant 0 : i32
    %c0_i32_0 = arith.constant 0 : i32
    %c0_i32_1 = arith.constant 0 : i32
    %c0_i32_2 = arith.constant 0 : i32
    return %c0_i32, %c0_i32_0, %c0_i32_1 : i32, i32, i32
  }
  func.func @transform_4(%arg0: i32) -> (i32, i32) {
    %c0_i32 = arith.constant 0 : i32
    %c0_i32_0 = arith.constant 0 : i32
    %c0_i32_1 = arith.constant 0 : i32
    return %c0_i32, %c0_i32_0 : i32, i32
  }
  func.func @transform_5(%arg0: i32) -> (i32, i32, i32) {
    %c0_i32 = arith.constant 0 : i32
    %c0_i32_0 = arith.constant 0 : i32
    %c0_i32_1 = arith.constant 0 : i32
    %c0_i32_2 = arith.constant 0 : i32
    return %c0_i32, %c0_i32_0, %c0_i32_1 : i32, i32, i32
  }
  func.func @transform_6(%arg0: i32) -> (i32, i32) {
    %c0_i32 = arith.constant 0 : i32
    %c0_i32_0 = arith.constant 0 : i32
    %c0_i32_1 = arith.constant 0 : i32
    return %c0_i32, %c0_i32_0 : i32, i32
  }
  func.func @transform_7(%arg0: i32) -> (i32, i32, i32) {
    %c0_i32 = arith.constant 0 : i32
    %c0_i32_0 = arith.constant 0 : i32
    %c0_i32_1 = arith.constant 0 : i32
    %c0_i32_2 = arith.constant 0 : i32
    return %c0_i32, %c0_i32_0, %c0_i32_1 : i32, i32, i32
  }
  func.func @transform_8(%arg0: i32) -> (i32, i32) {
    %c0_i32 = arith.constant 0 : i32
    %c0_i32_0 = arith.constant 0 : i32
    %c0_i32_1 = arith.constant 0 : i32
    return %c0_i32, %c0_i32_0 : i32, i32
  }
  func.func @transform_9(%arg0: i32) -> (i32, i32, i32) {
    %c0_i32 = arith.constant 0 : i32
    %c0_i32_0 = arith.constant 0 : i32
    %c0_i32_1 = arith.constant 0 : i32
    %c0_i32_2 = arith.constant 0 : i32
    return %c0_i32, %c0_i32_0, %c0_i32_1 : i32, i32, i32
  }
  func.func @transform_10(%arg0: i32) -> (i32, i32) {
    %c0_i32 = arith.constant 0 : i32
    %c0_i32_0 = arith.constant 0 : i32
    %c0_i32_1 = arith.constant 0 : i32
    return %c0_i32, %c0_i32_0 : i32, i32
  }
  func.func @transform_11(%arg0: i32) -> (i32, i32, i32) {
    %c0_i32 = arith.constant 0 : i32
    %c0_i32_0 = arith.constant 0 : i32
    %c0_i32_1 = arith.constant 0 : i32
    %c0_i32_2 = arith.constant 0 : i32
    return %c0_i32, %c0_i32_0, %c0_i32_1 : i32, i32, i32
  }
  func.func @transform_12(%arg0: i32) -> (i32, i32) {
    %c0_i32 = arith.constant 0 : i32
    %c0_i32_0 = arith.constant 0 : i32
    %c0_i32_1 = arith.constant 0 : i32
    return %c0_i32, %c0_i32_0 : i32, i32
  }
  func.func @transform_13(%arg0: i32) -> (i32, i32, i32) {
    %c0_i32 = arith.constant 0 : i32
    %c0_i32_0 = arith.constant 0 : i32
    %c0_i32_1 = arith.constant 0 : i32
    %c0_i32_2 = arith.constant 0 : i32
    return %c0_i32, %c0_i32_0, %c0_i32_1 : i32, i32, i32
  }
  func.func @transform_14(%arg0: i32) -> (i32, i32) {
    %c0_i32 = arith.constant 0 : i32
    %c0_i32_0 = arith.constant 0 : i32
    %c0_i32_1 = arith.constant 0 : i32
    return %c0_i32, %c0_i32_0 : i32, i32
  }
  func.func @transform_15(%arg0: i32) -> (i32, i32, i32) {
    %c0_i32 = arith.constant 0 : i32
    %c0_i32_0 = arith.constant 0 : i32
    %c0_i32_1 = arith.constant 0 : i32
    %c0_i32_2 = arith.constant 0 : i32
    return %c0_i32, %c0_i32_0, %c0_i32_1 : i32, i32, i32
  }
  func.func @transform_16(%arg0: i32) -> (i32, i32) {
    %c0_i32 = arith.constant 0 : i32
    %c0_i32_0 = arith.constant 0 : i32
    %c0_i32_1 = arith.constant 0 : i32
    return %c0_i32, %c0_i32_0 : i32, i32
  }
  func.func @transform_17(%arg0: i32) -> (i32, i32, i32) {
    %c0_i32 = arith.constant 0 : i32
    %c0_i32_0 = arith.constant 0 : i32
    %c0_i32_1 = arith.constant 0 : i32
    return %arg0, %c0_i32, %c0_i32_0 : i32, i32, i32
  }
}

</mosaic_0001>

<bundles_post_ra>
// kernel: cnn1d_autoencoder.1
= control target key start
LH: loop header
LB: loop body
LE: loop exit
PB: predicated region body
PF: predicated region fallthrough
CT: control target
= control target key end

     0   :  { %s3509_s0 = inlined_call_operand.vmem [shape: f32[2,1,128], index: 0, kind: input, shape index: {}]   ;;  %s3510_s1 = inlined_call_operand.vmem [shape: f32[5,8,1], index: 1, kind: input, shape index: {}]   ;;  %s3511_s2 = inlined_call_operand.vmem [shape: f32[8,1], index: 2, kind: input, shape index: {}]   ;;  %s3512_s3 = inlined_call_operand.vmem [shape: f32[3,16,8], index: 3, kind: input, shape index: {}]   ;;  %s3513_s4 = inlined_call_operand.vmem [shape: f32[16,1], index: 4, kind: input, shape index: {}]   ;;  %s3514_s5 = inlined_call_operand.vmem [shape: f32[3,32,16], index: 5, kind: input, shape index: {}]   ;;  %s3515_s6 = inlined_call_operand.vmem [shape: f32[32,1], index: 6, kind: input, shape index: {}]   ;;  %s3516_s7 = inlined_call_operand.vmem [shape: f32[3,64,32], index: 7, kind: input, shape index: {}]   ;;  %s3517_s8 = inlined_call_operand.vmem [shape: f32[64,1], index: 8, kind: input, shape index: {}]   ;;  %s3518_s9 = inlined_call_operand.vmem [shape: f32[3,32,64], index: 9, kind: input, shape index: {}]   ;;  %s3519_s10 = inlined_call_operand.vmem [shape: f32[32,1], index: 10, kind: input, shape index: {}]   ;;  %s3520_s11 = inlined_call_operand.vmem [shape: f32[3,16,32], index: 11, kind: input, shape index: {}]   ;;  %s3521_s12 = inlined_call_operand.vmem [shape: f32[16,1], index: 12, kind: input, shape index: {}]   ;;  %s3522_s13 = inlined_call_operand.vmem [shape: f32[3,8,16], index: 13, kind: input, shape index: {}]   ;;  %s3523_s14 = inlined_call_operand.vmem [shape: f32[8,1], index: 14, kind: input, shape index: {}]   ;;  %s3524_s15 = inlined_call_operand.vmem [shape: f32[3,1,8], index: 15, kind: input, shape index: {}]   ;;  %s3525_s16 = inlined_call_operand.<no memory space> [shape: f32[1,1], index: 16, kind: input, shape index: {}]   ;;  %s3526_s17 = inlined_call_operand.hbm [shape: f32[2,1,8], index: 17, kind: output, shape index: {}]  }
   0x1   :  { %3536 = sst [smem:[#allocation20_spill]] %s3509_s0  ;;  %v22_v0 = vstv %s3525_s16 }
   0x2   :  { %3537 = sst [smem:[#allocation21_spill]] %s3510_s1  ;;  %23 = vst [vmem:[#allocation10] sm:$0x1] %v22_v0 }
   0x3   :  { %3538 = sst [smem:[#allocation22_spill]] %s3511_s2 }
   0x4   :  { %24 = vsyncpa [#allocation12], 0 }
   0x5   :  { %26 = vsyncpa [#allocation12 + $0x1], 0  ;;  %s2809_s26 = smov 0   ;;  %s2811_s27 = smov 0  }
   0x6   :  { %s2813_s28 = smov 0   ;;  %s2815_s29 = smov 0  }
   0x7 LB: > { %3539 = sst [smem:[#allocation14_spill]] %s2693_s26  ;;  %s2830_s16 = sadd.s32 4294967295, %s2705_s29   ;;  %s2705_s29 = sphi %s2815_s29, %s3554_s29   ;;  %s2701_s28 = sphi %s2813_s28, %s3559_s28   ;;  %s2697_s27 = sphi %s2811_s27, %s3558_s27   ;;  %s2693_s26 = sphi %s2809_s26, %s3557_s26  }
   0x8   : > { %3540 = sst [smem:[#allocation15_spill]] %s2701_s28  ;;  %s2306_s0 = sadd.s32 4294967294, %s2705_s29  }
   0x9   : > { %3541 = sst [smem:[#allocation16_spill]] %s2705_s29  ;;  %s2834_s30 = sadd.s32 1, %s2705_s29  }
   0xa   : > { %3542 = sst [smem:[#allocation17_spill]] %s2834_s30  ;;  %s401_s18 = sadd.s32 1, %s2701_s28 }
   0xb   : > { %s398_s19 = ssub.s32 %s2705_s29, %s2834_s30  ;;  %p411_p0 = scmp.ne.s32.totalorder %s2701_s28, %s2697_s27 }
   0xc   : > { %p399_p1 = scmp.eq.s32.totalorder %s398_s19, 0  ;;  %p412_p2 = scmp.eq.s32.totalorder %s2830_s16, 1 }
   0xd   : > { %p417_p3 = scmp.ne.s32.totalorder %s2697_s27, %s2693_s26  ;;  %p418_p4 = scmp.eq.s32.totalorder %s2306_s0, 1 }
   0xe   : > { %s2845_s1 = scalar_select %p399_p1, %s2701_s28, %s401_s18  }
   0xf   : > { %p2847_p5 = por %p412_p2, %p411_p0  ;;  %p2851_p6 = por %p418_p4, %p417_p3 }
  0x10   : > { %3543 = sst [smem:[#allocation18_spill]] %s2845_s1  ;;  %p2309_p7 = scmp.ge.s32.totalorder %s2705_s29, 1 }
  0x11   : > { %s3545_s21 = scalar_select %p2851_p6, 1, 0 }
  0x12   : > { %p490_p8 = scmp.lt.s32.totalorder %s2705_s29, 3 }
  0x13   : > { %3546 = sst [smem:[#allocation19_spill]] %s3545_s21 }
  0x14   : > { %p491_p9 = pnand %p2309_p7, %p490_p8 }
  0x15   : > { %p539_p10 = scmp.lt.s32.totalorder (!%p491_p9), %s2830_s16, 1  ;;  %s3547_s24 = sld [smem:[#allocation21_spill]] (!%p491_p9) }
  0x16   : > { %494 = sbr.rel (%p491_p9) target bundleno = 3597 (0xe0d), region = 88  ;;  %s3548_s22 = sld [smem:[#allocation20_spill]] (!%p491_p9) }
  0x17   : > { %s2709_s28 = smov (!%p491_p9), 2   ;;  %s2710_s26 = smov (!%p491_p9), 126  }
  0x18   : > { %s2712_s29 = smov (!%p491_p9), 125   ;;  %s3549_s2 = sld [smem:[#allocation22_spill]] (!%p491_p9) }
  0x19   : > { %s2713_s21 = smov (!%p491_p9), 124   ;;  %s3550_s1 = smov (!%p491_p9), 127  }
  0x1a   : > { %s2250_s30 = scalar_lea.hbm (!%p491_p9), %s3526_s17, %s2830_s16  ;;  %s2663_s0 = scalar_lea.hbm (!%p491_p9), %s3526_s17, 2 }
  0x1b   : > { %v2311_v1 = vld [vmem:[%s3547_s24 + $0x10] sm:$0xff]  ;;  %v542_v2 = vlaneseq  ;;  %v2707_v3 = vmov 0   ;;  %v2313_v4 = vld [vmem:[%s3547_s24 + $0x20] sm:$0xff]  ;;  %s540_s18 = scalar_select %p539_p10, %s2830_s16, 1  ;;  %v2708_v5 = vmov 0.0   ;;  %v2312_v7 = vld [vmem:[%s3547_s24 + $0x18] sm:$0xff] }
  0x1c   : > { %2536 = vset.pattern.permute.xlu1 %v2707_v3  ;;  %2535 = vset.pattern.permute.xlu0 %v2707_v3  ;;  %v586_v8 = vld [vmem:[%s3547_s24] sm:$0xff]  ;;  %v2310_v9 = vld [vmem:[%s3547_s24 + $0x8] sm:$0xff]  ;;  %vm578_vm3 = vcmask 15360   ;;  %v2714_v34 = vmov 1.0  }
  0x1d   : > { %626 = vperm.xlu1 %2536, %v2311_v1   ;;  %2537 = vset.pattern.permute.xlu2 %v2707_v3  ;;  %vm544_vm0 = vcmp.lt.s32.totalorder %v542_v2, 132  ;;  %s541_s23 = scalar_lea.vmem %s3548_s22, %s540_s18  ;;  %vm581_vm1 = vcmp.ge.s32.totalorder %v542_v2, 2  ;;  %vm582_vm2 = vcmp.lt.s32.totalorder %v542_v2, 130  ;;  %v697_v29 = vand.u32 127, %v542_v2  ;;  %s2715_s18 = smov 1  }
  0x1e   : > { %664 = vperm.xlu2 %2537, %v2313_v4   ;;  %546 = vst.msk [vmem:[#allocation2] sm:$0x3] %vm544_vm0, %v2708_v5  ;;  %v573_v6 = vld [vmem:[%s541_s23] sm:$0x1]  ;;  %vm583_vm4 = vmand %vm581_vm1, %vm582_vm2  ;;  %v2885_v30 = vshrl.u32 %v542_v2, 7  ;;  %s2254_s22 = sshll.u32 %s2250_s30, 4  ;;  %s2255_s22 = int_to_ptr.hbm [resolvable:$true] %s2254_s22 }
  0x1f   : > { %575 = vrot.lane.b32.xlu0 %v573_v6, %s2709_s28  ;;  %s3534_s28 = smov 127   ;;  %v747_v25 = vld [vmem:[%s3549_s2] sm:$0xff]  ;;  %v2887_v31 = vmul.u32 2, %v697_v29 }
  0x20   : > { %v695_v32 = vadd.s32 120, %v2885_v30  ;;  %v694_v33 = vadd.s32 112, %v2885_v30  ;;  %v693_v35 = vadd.s32 104, %v2885_v30  ;;  %v692_v36 = vadd.s32 96, %v2885_v30 }
  0x21   : > { %v691_v37 = vadd.s32 88, %v2885_v30  ;;  %v690_v38 = vadd.s32 80, %v2885_v30  ;;  %v689_v39 = vadd.s32 72, %v2885_v30  ;;  %v688_v40 = vadd.s32 64, %v2885_v30 }
  0x22   : > { %vm714_vm5 = vcmp.eq.s32.totalorder %v695_v32, %v2887_v31  ;;  %vm713_vm6 = vcmp.eq.s32.totalorder %v694_v33, %v2887_v31  ;;  %vm712_vm7 = vcmp.eq.s32.totalorder %v693_v35, %v2887_v31  ;;  %vm711_vm8 = vcmp.eq.s32.totalorder %v692_v36, %v2887_v31 }
  0x23   : > { %2330 = vmatpush.msk.msra.mxu0 %vm714_vm5, %v2714_v34  ;;  %vm710_vm9 = vcmp.eq.s32.totalorder %v691_v37, %v2887_v31  ;;  %vm709_vm10 = vcmp.eq.s32.totalorder %v690_v38, %v2887_v31  ;;  %vm708_vm11 = vcmp.eq.s32.totalorder %v689_v39, %v2887_v31  ;;  %vm707_vm12 = vcmp.eq.s32.totalorder %v688_v40, %v2887_v31  ;;  %v1102_v37 = vld [vmem:[%s3515_s6 + $0x18] sm:$0xff]  ;;  %v1099_v39 = vld [vmem:[%s3515_s6] sm:$0xff] }
  0x24   : > { %v2913_v41 = vadd.s32 56, %v2885_v30  ;;  %v2916_v42 = vadd.s32 48, %v2885_v30  ;;  %v2928_v43 = vadd.s32 40, %v2885_v30  ;;  %v2937_v44 = vadd.s32 32, %v2885_v30 }
  0x25   : > { %645 = vperm.xlu1 %2536, %v2312_v7   ;;  %2331 = vmatpush.msk.msra.mxu0 %vm713_vm6, %v2714_v34  ;;  %v2946_v45 = vadd.s32 24, %v2885_v30  ;;  %v2955_v46 = vadd.s32 16, %v2885_v30  ;;  %v2964_v47 = vadd.s32 8, %v2885_v30  ;;  %vm618_vm5 = vcmask 1039360  }
  0x26   : > { %589 = vperm.xlu2 %2537, %v586_v8   ;;  %vm706_vm13 = vcmp.eq.s32.totalorder %v2913_v41, %v2887_v31  ;;  %vm705_vm14 = vcmp.eq.s32.totalorder %v2916_v42, %v2887_v31  ;;  %vm704_vm15 = vcmp.eq.s32.totalorder %v2928_v43, %v2887_v31  ;;  %vm703_vm0 = vcmp.eq.s32.totalorder %v2937_v44, %v2887_v31  ;;  %v887_v8 = vld [vmem:[%s3513_s4 + $0x8] sm:$0xff] }
  0x27   : > { %602 = vperm.xlu0 %2535, %v2310_v9   ;;  %2332 = vmatpush.msk.msra.mxu0 %vm712_vm7, %v2714_v34  ;;  %vm702_vm1 = vcmp.eq.s32.totalorder %v2946_v45, %v2887_v31  ;;  %vm701_vm2 = vcmp.eq.s32.totalorder %v2955_v46, %v2887_v31  ;;  %vm637_vm6 = vcmask 1031168   ;;  %vm656_vm7 = vcmask 1022976   ;;  %v1100_v45 = vld [vmem:[%s3515_s6 + $0x8] sm:$0xff]  ;;  %v1101_v46 = vld [vmem:[%s3515_s6 + $0x10] sm:$0xff] }
  0x29   : > { %2333 = vmatpush.msk.msra.mxu0 %vm711_vm8, %v2714_v34  ;;  %vm675_vm8 = vcmask 1014784  }
  0x2b   : > { %2334 = vmatpush.msk.msra.mxu0 %vm710_vm9, %v2714_v34  ;;  %vm547_vm9 = vcmask 539648  }
  0x2c   : > { %548 = vst.msk [vmem:[#allocation3] sm:$0xff] %vm547_vm9, %v2708_v5 }
  0x2d   : > { %2335 = vmatpush.msk.msra.mxu0 %vm709_vm10, %v2714_v34  ;;  %vm778_vm10 = vcmask 531464  }
  0x2f   : > { %2336 = vmatpush.msk.msra.mxu0 %vm708_vm11, %v2714_v34  ;;  %vm790_vm11 = vcmask 64512  }
  0x31   : > { %2337 = vmatpush.msk.msra.mxu0 %vm707_vm12, %v2714_v34  ;;  %vm898_vm12 = vcmask 523264  }
  0x33   : > { %2338 = vmatpush.msk.msra.mxu0 %vm706_vm13, %v2714_v34 }
  0x35   : > { %2339 = vmatpush.msk.msra.mxu0 %vm705_vm14, %v2714_v34 }
  0x37   : > { %2340 = vmatpush.msk.msra.mxu0 %vm704_vm15, %v2714_v34 }
  0x39   : > { %2341 = vmatpush.msk.msra.mxu0 %vm703_vm0, %v2714_v34 }
  0x3b   : > { %2342 = vmatpush.msk.msra.mxu0 %vm702_vm1, %v2714_v34 }
  0x3d   : > { %2343 = vmatpush.msk.msra.mxu0 %vm701_vm2, %v2714_v34 }
  0x78   : > { %v665_v26 = vpop.permute.xlu2 %664 }
  0x80   : > { %v590_v48 = vpop.permute.xlu2 %589 }
  0x8f   : > { %v627_v13 = vpop.permute.xlu1 %626 }
  0x91   : > { %v576_v10 = vpop.permute.xlu0 %575 }
  0x92   : > { %v577_v11 = vrot.slane %v576_v10, 7 }
  0x94   : > { %v579_v12 = vsel %vm578_vm3, %v577_v11, %v576_v10  ;;  %vm700_vm3 = vcmp.eq.s32.totalorder %v2964_v47, %v2887_v31  ;;  %v886_v11 = vld [vmem:[%s3513_s4] sm:$0xff] }
  0x95   : > { %584 = vst.msk [vmem:[#allocation2] sm:$0x3] %vm583_vm4, %v579_v12  ;;  %2344 = vmatpush.msk.msra.mxu0 %vm700_vm3, %v2714_v34  ;;  %vm699_vm4 = vcmp.eq.s32.totalorder %v2885_v30, %v2887_v31  ;;  %v781_v12 = vld [vmem:[%s3512_s3] sm:$0xff] }
  0x96   : > { %v943_v47 = vld [vmem:[%s3514_s5] sm:$0xff] }
  0x97   : > { %v646_v21 = vpop.permute.xlu1 %645  ;;  %2345 = vmatpush.msk.msra.mxu0 %vm699_vm4, %v2714_v34 }
  0x99   : > { %v603_v17 = vpop.permute.xlu0 %602  ;;  %2386 = vmatpush.msk.msrb.mxu0 %vm702_vm1, %v2714_v34 }
  0x9b   : > { %2387 = vmatpush.msk.msrb.mxu0 %vm701_vm2, %v2714_v34 }
  0x9c   : > { %v597_v14 = vld [vmem:[#allocation2] sm:$0x3] }
  0x9d   : > { %v606_v15 = vperm.slane %v597_v14, 0  ;;  %v607_v16 = vperm.slane %v597_v14, 1  ;;  %2388 = vmatpush.msk.msrb.mxu0 %vm700_vm3, %v2714_v34  ;;  %v2638_v52 = vld [vmem:[#allocation2] ss:$0 sm:$0xff] }
  0x9e   : > { %v595_v55 = vmul.f32 %v2638_v52, %v590_v48  ;;  %v2352_v14 = vld [vmem:[%s3512_s3 + $0x20] sm:$0xff]  ;;  %v944_v48 = vld [vmem:[%s3514_s5 + $0x8] sm:$0xff] }
  0x9f   : > { %v629_v18 = vmul.f32 %v627_v13, %v606_v15  ;;  %v610_v19 = vmul.f32 %v606_v15, %v603_v17  ;;  %v611_v20 = vmul.f32 %v607_v16, %v603_v17  ;;  %v649_v22 = vmul.f32 %v646_v21, %v607_v16  ;;  %2389 = vmatpush.msk.msrb.mxu0 %vm699_vm4, %v2714_v34  ;;  %v2346_v17 = vld [vmem:[%s3512_s3 + $0x10] sm:$0xff]  ;;  %v2366_v52 = vld [vmem:[%s3514_s5 + $0x20] sm:$0xff] }
  0xa0   : > { %v630_v23 = vmul.f32 %v627_v13, %v607_v16  ;;  %v648_v24 = vmul.f32 %v646_v21, %v606_v15  ;;  %v667_v27 = vmul.f32 %v665_v26, %v606_v15  ;;  %v668_v28 = vmul.f32 %v665_v26, %v607_v16  ;;  %v782_v13 = vld [vmem:[%s3512_s3 + $0x8] sm:$0xff] }
  0xa1   : > { %633 = vrot.lane.b32.xlu0 %v629_v18, %s2710_s26  ;;  %616 = vrot.lane.b32.xlu2 %v611_v20, %s3534_s28  ;;  %v2353_v16 = vld [vmem:[%s3512_s3 + $0x28] sm:$0xff] }
  0xa2   : > { %614 = vrot.lane.b32.xlu1 %v610_v19, %s3534_s28  ;;  %v2347_v19 = vld [vmem:[%s3512_s3 + $0x18] sm:$0xff] }
  0xa9   : > { %654 = vrot.lane.b32.xlu0 %v649_v22, %s2712_s29  ;;  %652 = vrot.lane.b32.xlu2 %v648_v24, %s2712_s29 }
  0xaa   : > { %635 = vrot.lane.b32.xlu1 %v630_v23, %s2710_s26 }
  0xb1   : > { %750 = vperm.xlu0 %2535, %v747_v25   ;;  %673 = vrot.lane.b32.xlu2 %v668_v28, %s2713_s21 }
  0xb2   : > { %671 = vrot.lane.b32.xlu1 %v667_v27, %s2713_s21 }
  0xfb   : > { %v617_v49 = vpop.permute.xlu2 %616 }
 0x103   : > { %v653_v53 = vpop.permute.xlu2 %652 }
 0x10b   : > { %v674_v62 = vpop.permute.xlu2 %673 }
 0x113   : > { %v634_v51 = vpop.permute.xlu0 %633 }
 0x114   : > { %v615_v50 = vpop.permute.xlu1 %614 }
 0x115   : > { %v619_v54 = vsel %vm618_vm5, %v615_v50, %v617_v49 }
 0x116   : > { %v621_v58 = vadd.f32 %v619_v54, %v595_v55  ;;  %v2367_v54 = vld [vmem:[%s3514_s5 + $0x28] sm:$0xff]  ;;  %v946_v55 = vld [vmem:[%s3514_s5 + $0x18] sm:$0xff] }
 0x11b   : > { %v655_v60 = vpop.permute.xlu0 %654 }
 0x11c   : > { %v636_v56 = vpop.permute.xlu1 %635  ;;  %v657_v61 = vsel %vm656_vm7, %v653_v53, %v655_v60  ;;  %v945_v53 = vld [vmem:[%s3514_s5 + $0x10] sm:$0xff]  ;;  %v2378_v60 = vld [vmem:[%s3514_s5 + $0x40] sm:$0xff] }
 0x11d   : > { %v638_v57 = vsel %vm637_vm6, %v634_v51, %v636_v56  ;;  %v2368_v56 = vld [vmem:[%s3514_s5 + $0x30] sm:$0xff] }
 0x11e   : > { %v640_v59 = vadd.f32 %v638_v57, %v621_v58 }
 0x120   : > { %v659_v63 = vadd.f32 %v657_v61, %v640_v59  ;;  %v2369_v61 = vld [vmem:[%s3514_s5 + $0x38] sm:$0xff] }
 0x123   : > { %v751_v3 = vpop.permute.xlu0 %750 }
 0x124   : > { %v672_v0 = vpop.permute.xlu1 %671 }
 0x125   : > { %v676_v1 = vsel %vm675_vm8, %v672_v0, %v674_v62  ;;  %v2379_v62 = vld [vmem:[%s3514_s5 + $0x48] sm:$0xff]  ;;  %v2381_v0 = vld [vmem:[%s3514_s5 + $0x58] sm:$0xff]  ;;  %vm2239_vm8 = vcmask 57344  }
 0x126   : > { %v678_v2 = vadd.f32 %v676_v1, %v659_v63  ;;  %v2380_v63 = vld [vmem:[%s3514_s5 + $0x50] sm:$0xff] }
 0x128   : > { %769 = vmatmul.f32.vlgmr.msra.gmra.mxu0 %v678_v2 }
 0x129   : > { %2434 = vmatpush.msk.msra.mxu0 %vm700_vm3, %v2714_v34 }
 0x12b   : > { %2435 = vmatpush.msk.msra.mxu0 %vm699_vm4, %v2714_v34 }
 0x1a5   : > { %v770_v4 = vpop.f32.mrf.mxu0 }
 0x1a6   : > { %v771_v6 = vadd.f32 %v770_v4, %v751_v3 }
 0x1a8   : > { %v773_v7 = vmax.f32 %v771_v6, 0.0 }
 0x1aa   : > { %775 = vrot.lane.b32.xlu1 %v773_v7, %s2715_s18 }
 0x1b2   : > { %895 = vperm.xlu1 %2536, %v887_v8  }
 0x21c   : > { %v776_v9 = vpop.permute.xlu1 %775 }
 0x21d   : > { %779 = vst.msk [vmem:[#allocation3] sm:$0xff] %vm778_vm10, %v776_v9 }
 0x224   : > { %v780_v10 = vld [vmem:[#allocation3] sm:$0xff] }
 0x225   : > { %787 = vrot.lane.b32.xlu0 %v780_v10, %s3534_s28  ;;  %852 = vrot.lane.b32.xlu2 %v780_v10, %s2710_s26 }
 0x226   : > { %841 = vmatpush.msra.mxu2 %v780_v10 }
 0x227   : > { %2350 = vmatmul.msk.f32.vlgmr.msra.gmra.mxu2 %vm790_vm11, %v781_v12 }
 0x22d   : > { %890 = vperm.xlu2 %2537, %v886_v11  }
 0x22f   : > { %2351 = vmatmul.msk.f32.gmra.mxu2 %vm790_vm11, %v782_v13 }
 0x27f   : > { %v853_v15 = vpop.permute.xlu2 %852 }
 0x280   : > { %876 = vmatpush.msra.mxu3 %v853_v15 }
 0x281   : > { %2354 = vmatmul.msk.f32.vlgmr.msra.gmra.mxu3 %vm790_vm11, %v2352_v14 }
 0x287   : > { %v891_v30 = vpop.permute.xlu2 %890 }
 0x289   : > { %2355 = vmatmul.msk.f32.gmra.mxu3 %vm790_vm11, %v2353_v16 }
 0x297   : > { %v788_v18 = vpop.permute.xlu0 %787 }
 0x298   : > { %812 = vmatpush.msra.mxu1 %v788_v18 }
 0x299   : > { %2348 = vmatmul.msk.f32.vlgmr.msra.gmra.mxu1 %vm790_vm11, %v2346_v17 }
 0x29a   : > { %2356 = vmatpush.msk.msrb.mxu1 %vm706_vm13, %v2714_v34  ;;  %vm549_vm13 = vcmask 277504  }
 0x29b   : > { %550 = vst.msk [vmem:[#allocation4] sm:$0xff] %vm549_vm13, %v2708_v5 }
 0x29c   : > { %2357 = vmatpush.msk.msrb.mxu1 %vm705_vm14, %v2714_v34  ;;  %551 = vst.msk [vmem:[#allocation4 + $0x8] sm:$0xff] %vm549_vm13, %v2708_v5  ;;  %vm938_vm14 = vcmask 269320  }
 0x29e   : > { %2358 = vmatpush.msk.msrb.mxu1 %vm704_vm15, %v2714_v34  ;;  %vm960_vm15 = vcmask 130048  }
 0x2a0   : > { %2359 = vmatpush.msk.msrb.mxu1 %vm703_vm0, %v2714_v34  ;;  %vm1123_vm0 = vcmask 261120  }
 0x2a1   : > { %2349 = vmatmul.msk.f32.gmra.mxu1 %vm790_vm11, %v2347_v19 }
 0x2a2   : > { %2360 = vmatpush.msk.msrb.mxu1 %vm702_vm1, %v2714_v34  ;;  %vm552_vm1 = vcmask 146432  }
 0x2a3   : > { %556 = vst.msk [vmem:[#allocation5 + $0x18] sm:$0xff] %vm552_vm1, %v2708_v5 }
 0x2a4   : > { %2361 = vmatpush.msk.msrb.mxu1 %vm701_vm2, %v2714_v34  ;;  %553 = vst.msk [vmem:[#allocation5] sm:$0xff] %vm552_vm1, %v2708_v5  ;;  %vm1185_vm2 = vcmask 138248  }
 0x2a5   : > { %554 = vst.msk [vmem:[#allocation5 + $0x8] sm:$0xff] %vm552_vm1, %v2708_v5 }
 0x2a6   : > { %2362 = vmatpush.msk.msrb.mxu1 %vm700_vm3, %v2714_v34  ;;  %555 = vst.msk [vmem:[#allocation5 + $0x10] sm:$0xff] %vm552_vm1, %v2708_v5  ;;  %vm557_vm3 = vcmask 80896  }
 0x2a7   : > { %563 = vst.msk [vmem:[#allocation6 + $0x28] sm:$0xff] %vm557_vm3, %v2708_v5 }
 0x2a8   : > { %2363 = vmatpush.msk.msrb.mxu1 %vm699_vm4, %v2714_v34  ;;  %v896_v34 = vpop.permute.xlu1 %895  ;;  %558 = vst.msk [vmem:[#allocation6] sm:$0xff] %vm557_vm3, %v2708_v5  ;;  %vm1604_vm4 = vcmask 72712  }
 0x2a9   : > { %559 = vst.msk [vmem:[#allocation6 + $0x8] sm:$0xff] %vm557_vm3, %v2708_v5 }
 0x2aa   : > { %v843_v20 = vpop.f32.mrf.mxu2  ;;  %560 = vst.msk [vmem:[#allocation6 + $0x10] sm:$0xff] %vm557_vm3, %v2708_v5 }
 0x2ab   : > { %561 = vst.msk [vmem:[#allocation6 + $0x18] sm:$0xff] %vm557_vm3, %v2708_v5 }
 0x2ac   : > { %562 = vst.msk [vmem:[#allocation6 + $0x20] sm:$0xff] %vm557_vm3, %v2708_v5 }
 0x2ad   : > { %564 = vst.msk [vmem:[#allocation6 + $0x30] sm:$0xff] %vm557_vm3, %v2708_v5 }
 0x2ae   : > { %565 = vst.msk [vmem:[#allocation6 + $0x38] sm:$0xff] %vm557_vm3, %v2708_v5 }
 0x2af   : > { %566 = vst.msk [vmem:[#allocation7] sm:$0xff] %vm557_vm3, %v2708_v5 }
 0x2b0   : > { %567 = vst.msk [vmem:[#allocation7 + $0x8] sm:$0xff] %vm557_vm3, %v2708_v5 }
 0x2b1   : > { %568 = vst.msk [vmem:[#allocation7 + $0x10] sm:$0xff] %vm557_vm3, %v2708_v5 }
 0x2b2   : > { %v846_v25 = vpop.f32.mrf.mxu2  ;;  %569 = vst.msk [vmem:[#allocation7 + $0x18] sm:$0xff] %vm557_vm3, %v2708_v5 }
 0x2b3   : > { %570 = vst.msk [vmem:[#allocation8] sm:$0xff] %vm557_vm3, %v2708_v5 }
 0x2b4   : > { %571 = vst.msk [vmem:[#allocation8 + $0x8] sm:$0xff] %vm557_vm3, %v2708_v5 }
 0x2b5   : > { %572 = vst.msk [vmem:[#allocation9] sm:$0xff] %vm557_vm3, %v2708_v5 }
 0x304   : > { %v878_v21 = vpop.f32.mrf.mxu3 }
 0x30c   : > { %v881_v27 = vpop.f32.mrf.mxu3 }
 0x316   : > { %v814_v22 = vpop.f32.mrf.mxu1 }
 0x317   : > { %v844_v23 = vadd.f32 %v843_v20, %v814_v22 }
 0x319   : > { %v884_v24 = vadd.f32 %v878_v21, %v844_v23 }
 0x31b   : > { %2364 = vmatmul.msk.f32.vlgmr.msrb.gmra.mxu1 %vm898_vm12, %v884_v24 }
 0x31e   : > { %v817_v26 = vpop.f32.mrf.mxu1 }
 0x31f   : > { %v847_v28 = vadd.f32 %v846_v25, %v817_v26 }
 0x321   : > { %v885_v29 = vadd.f32 %v881_v27, %v847_v28 }
 0x323   : > { %2365 = vmatmul.msk.f32.gmra.mxu1 %vm898_vm12, %v885_v29 }
 0x398   : > { %v922_v31 = vpop.f32.mrf.mxu1 }
 0x399   : > { %v923_v32 = vadd.f32 %v922_v31, %v891_v30 }
 0x39b   : > { %v928_v33 = vmax.f32 %v923_v32, 0.0 }
 0x39d   : > { %932 = vrot.lane.b32.xlu1 %v928_v33, %s2715_s18 }
 0x3a0   : > { %v925_v35 = vpop.f32.mrf.mxu1 }
 0x3a1   : > { %v926_v36 = vadd.f32 %v925_v35, %v896_v34 }
 0x3a3   : > { %v929_v38 = vmax.f32 %v926_v36, 0.0 }
 0x3a5   : > { %1120 = vperm.xlu1 %2536, %v1102_v37   ;;  %934 = vrot.lane.b32.xlu0 %v929_v38, %s2715_s18 }
 0x3ad   : > { %1105 = vperm.xlu1 %2536, %v1099_v39  }
 0x40f   : > { %v933_v40 = vpop.permute.xlu1 %932 }
 0x410   : > { %939 = vst.msk [vmem:[#allocation4] sm:$0xff] %vm938_vm14, %v933_v40 }
 0x417   : > { %v935_v41 = vpop.permute.xlu0 %934  ;;  %v941_v43 = vld [vmem:[#allocation4] sm:$0xff]  ;;  %v1121_v31 = vpop.permute.xlu1 %1120 }
 0x418   : > { %940 = vst.msk [vmem:[#allocation4 + $0x8] sm:$0xff] %vm938_vm14, %v935_v41 }
 0x41f   : > { %v942_v42 = vld [vmem:[#allocation4 + $0x8] sm:$0xff]  ;;  %v1106_v35 = vpop.permute.xlu1 %1105 }
 0x420   : > { %1028 = vmatpush.msrb.mxu3 %v942_v42  ;;  %v2543_v44 = vpack.i.bf16 %v941_v43, %v942_v42 }
 0x422   : > { %2544 = vrot.lane.b32.xlu0 %v2543_v44, %s2710_s26  ;;  %2539 = vrot.lane.b32.xlu2 %v2543_v44, %s3534_s28 }
 0x423   : > { %1029 = vmatpush.msrb.mxu3 %v941_v43 }
 0x424   : > { %2374 = vmatmul.msk.f32.vlgmr.msrb.gmra.mxu3 %vm960_vm15, %v943_v47 }
 0x42a   : > { %1110 = vperm.xlu0 %2535, %v1100_v45   ;;  %1115 = vperm.xlu2 %2537, %v1101_v46  }
 0x42c   : > { %2375 = vmatmul.msk.f32.gmra.mxu3 %vm960_vm15, %v944_v48  ;;  %v1458_v48 = vld [vmem:[%s3517_s8 + $0x38] sm:$0xff] }
 0x434   : > { %2376 = vmatmul.msk.f32.gmra.mxu3 %vm960_vm15, %v945_v53  ;;  %v1452_v53 = vld [vmem:[%s3517_s8 + $0x8] sm:$0xff] }
 0x43c   : > { %2377 = vmatmul.msk.f32.gmra.mxu3 %vm960_vm15, %v946_v55  ;;  %v1453_v55 = vld [vmem:[%s3517_s8 + $0x10] sm:$0xff] }
 0x47c   : > { %v2540_v49 = vpop.permute.xlu2 %2539 }
 0x47d   : > { %v2541_v50 = vunpack.i.l.bf16 %v2540_v49  ;;  %v2542_v51 = vunpack.i.h.bf16 %v2540_v49  ;;  %v1457_v49 = vld [vmem:[%s3517_s8 + $0x30] sm:$0xff] }
 0x47f   : > { %987 = vmatpush.msrb.mxu2 %v2541_v50  ;;  %v1455_v50 = vld [vmem:[%s3517_s8 + $0x20] sm:$0xff] }
 0x481   : > { %988 = vmatpush.msrb.mxu2 %v2542_v51  ;;  %v1454_v51 = vld [vmem:[%s3517_s8 + $0x18] sm:$0xff] }
 0x482   : > { %2370 = vmatmul.msk.f32.vlgmr.msrb.gmra.mxu2 %vm960_vm15, %v2366_v52  ;;  %v1456_v52 = vld [vmem:[%s3517_s8 + $0x28] sm:$0xff] }
 0x484   : > { %v1116_v27 = vpop.permute.xlu2 %1115 }
 0x48a   : > { %2371 = vmatmul.msk.f32.gmra.mxu2 %vm960_vm15, %v2367_v54  ;;  %v1451_v54 = vld [vmem:[%s3517_s8] sm:$0xff] }
 0x492   : > { %2372 = vmatmul.msk.f32.gmra.mxu2 %vm960_vm15, %v2368_v56 }
 0x494   : > { %v2545_v57 = vpop.permute.xlu0 %2544 }
 0x495   : > { %v2546_v58 = vunpack.i.l.bf16 %v2545_v57  ;;  %v2547_v59 = vunpack.i.h.bf16 %v2545_v57 }
 0x497   : > { %1080 = vmatpush.msra.mxu1 %v2546_v58  ;;  %v1194_v58 = vld [vmem:[%s3516_s7] sm:$0xff] }
 0x499   : > { %1081 = vmatpush.msra.mxu1 %v2547_v59 }
 0x49a   : > { %2382 = vmatmul.msk.f32.vlgmr.msra.gmra.mxu1 %vm960_vm15, %v2378_v60  ;;  %2373 = vmatmul.msk.f32.gmra.mxu2 %vm960_vm15, %v2369_v61  ;;  %v1195_v60 = vld [vmem:[%s3516_s7 + $0x8] sm:$0xff]  ;;  %v1196_v61 = vld [vmem:[%s3516_s7 + $0x10] sm:$0xff] }
 0x49c   : > { %v1111_v23 = vpop.permute.xlu0 %1110 }
 0x4a2   : > { %2383 = vmatmul.msk.f32.gmra.mxu1 %vm960_vm15, %v2379_v62 }
 0x4a7   : > { %v1031_v1 = vpop.f32.mrf.mxu3 }
 0x4aa   : > { %2384 = vmatmul.msk.f32.gmra.mxu1 %vm960_vm15, %v2380_v63 }
 0x4af   : > { %v1034_v4 = vpop.f32.mrf.mxu3 }
 0x4b2   : > { %2385 = vmatmul.msk.f32.gmra.mxu1 %vm960_vm15, %v2381_v0 }
 0x4b7   : > { %v1037_v10 = vpop.f32.mrf.mxu3 }
 0x4bf   : > { %v1040_v18 = vpop.f32.mrf.mxu3 }
 0x505   : > { %v990_v2 = vpop.f32.mrf.mxu2 }
 0x506   : > { %v1032_v3 = vadd.f32 %v1031_v1, %v990_v2  ;;  %v1197_v1 = vld [vmem:[%s3516_s7 + $0x18] sm:$0xff] }
 0x50d   : > { %v993_v6 = vpop.f32.mrf.mxu2 }
 0x50e   : > { %v1035_v9 = vadd.f32 %v1034_v4, %v993_v6  ;;  %v2394_v6 = vld [vmem:[%s3516_s7 + $0x40] sm:$0xff] }
 0x515   : > { %v996_v12 = vpop.f32.mrf.mxu2 }
 0x516   : > { %v1038_v14 = vadd.f32 %v1037_v10, %v996_v12  ;;  %v2395_v12 = vld [vmem:[%s3516_s7 + $0x48] sm:$0xff] }
 0x517   : > { %v1083_v7 = vpop.f32.mrf.mxu1 }
 0x518   : > { %v1095_v8 = vadd.f32 %v1083_v7, %v1032_v3 }
 0x51a   : > { %2390 = vmatmul.msk.f32.vlgmr.msrb.gmra.mxu0 %vm1123_vm0, %v1095_v8 }
 0x51d   : > { %v999_v17 = vpop.f32.mrf.mxu2 }
 0x51e   : > { %v1041_v19 = vadd.f32 %v1040_v18, %v999_v17  ;;  %v2420_v17 = vld [vmem:[%s3516_s7 + $0x90] sm:$0xff]  ;;  %v2397_v18 = vld [vmem:[%s3516_s7 + $0x58] sm:$0xff] }
 0x51f   : > { %v1086_v11 = vpop.f32.mrf.mxu1 }
 0x520   : > { %v1096_v13 = vadd.f32 %v1086_v11, %v1035_v9  ;;  %v1198_v9 = vld [vmem:[%s3516_s7 + $0x20] sm:$0xff] }
 0x521   : > { %v2418_v11 = vld [vmem:[%s3516_s7 + $0x80] sm:$0xff] }
 0x522   : > { %2391 = vmatmul.msk.f32.gmra.mxu0 %vm1123_vm0, %v1096_v13  ;;  %v1199_v13 = vld [vmem:[%s3516_s7 + $0x28] sm:$0xff] }
 0x527   : > { %v1089_v15 = vpop.f32.mrf.mxu1 }
 0x528   : > { %v1097_v16 = vadd.f32 %v1089_v15, %v1038_v14  ;;  %v2419_v14 = vld [vmem:[%s3516_s7 + $0x88] sm:$0xff]  ;;  %v2396_v15 = vld [vmem:[%s3516_s7 + $0x50] sm:$0xff] }
 0x52a   : > { %2392 = vmatmul.msk.f32.gmra.mxu0 %vm1123_vm0, %v1097_v16  ;;  %v1200_v16 = vld [vmem:[%s3516_s7 + $0x30] sm:$0xff] }
 0x52f   : > { %v1092_v20 = vpop.f32.mrf.mxu1 }
 0x530   : > { %v1098_v21 = vadd.f32 %v1092_v20, %v1041_v19  ;;  %v1201_v19 = vld [vmem:[%s3516_s7 + $0x38] sm:$0xff] }
 0x531   : > { %v2421_v20 = vld [vmem:[%s3516_s7 + $0x98] sm:$0xff] }
 0x532   : > { %2393 = vmatmul.msk.f32.gmra.mxu0 %vm1123_vm0, %v1098_v21  ;;  %v2398_v21 = vld [vmem:[%s3516_s7 + $0x60] sm:$0xff] }
 0x597   : > { %v1153_v22 = vpop.f32.mrf.mxu0 }
 0x598   : > { %v1154_v36 = vadd.f32 %v1153_v22, %v1106_v35  ;;  %v2422_v22 = vld [vmem:[%s3516_s7 + $0xa0] sm:$0xff] }
 0x59a   : > { %v1165_v37 = vmax.f32 %v1154_v36, 0.0 }
 0x59f   : > { %v1156_v24 = vpop.f32.mrf.mxu0 }
 0x5a0   : > { %v1157_v25 = vadd.f32 %v1156_v24, %v1111_v23  ;;  %v2399_v23 = vld [vmem:[%s3516_s7 + $0x68] sm:$0xff] }
 0x5a1   : > { %v2423_v24 = vld [vmem:[%s3516_s7 + $0xa8] sm:$0xff] }
 0x5a2   : > { %v1166_v26 = vmax.f32 %v1157_v25, 0.0  ;;  %v2400_v25 = vld [vmem:[%s3516_s7 + $0x70] sm:$0xff] }
 0x5a4   : > { %1175 = vrot.lane.b32.xlu1 %v1166_v26, %s2715_s18  ;;  %v2424_v26 = vld [vmem:[%s3516_s7 + $0xb0] sm:$0xff] }
 0x5a7   : > { %v1159_v28 = vpop.f32.mrf.mxu0 }
 0x5a8   : > { %v1160_v29 = vadd.f32 %v1159_v28, %v1116_v27  ;;  %v2401_v27 = vld [vmem:[%s3516_s7 + $0x78] sm:$0xff] }
 0x5a9   : > { %v2425_v28 = vld [vmem:[%s3516_s7 + $0xb8] sm:$0xff] }
 0x5aa   : > { %v1167_v30 = vmax.f32 %v1160_v29, 0.0 }
 0x5ac   : > { %1177 = vrot.lane.b32.xlu0 %v1167_v30, %s2715_s18 }
 0x5af   : > { %v1162_v32 = vpop.f32.mrf.mxu0 }
 0x5b0   : > { %v1163_v33 = vadd.f32 %v1162_v32, %v1121_v31 }
 0x5b2   : > { %v1168_v34 = vmax.f32 %v1163_v33, 0.0 }
 0x5b4   : > { %1179 = vrot.lane.b32.xlu2 %v1168_v34, %s2715_s18 }
 0x5bc   : > { %1173 = vrot.lane.b32.xlu2 %v1165_v37, %s2715_s18 }
 0x60e   : > { %v1180_v38 = vpop.permute.xlu2 %1179 }
 0x60f   : > { %1189 = vst.msk [vmem:[#allocation5 + $0x18] sm:$0xff] %vm1185_vm2, %v1180_v38 }
 0x616   : > { %v1174_v39 = vpop.permute.xlu2 %1173  ;;  %v1176_v40 = vpop.permute.xlu1 %1175  ;;  %v1193_v41 = vld [vmem:[#allocation5 + $0x18] sm:$0xff] }
 0x617   : > { %1186 = vst.msk [vmem:[#allocation5] sm:$0xff] %vm1185_vm2, %v1174_v39  ;;  %1328 = vmatpush.msra.mxu3 %v1193_v41 }
 0x618   : > { %1187 = vst.msk [vmem:[#allocation5 + $0x8] sm:$0xff] %vm1185_vm2, %v1176_v40 }
 0x61e   : > { %v1178_v42 = vpop.permute.xlu0 %1177  ;;  %v1190_v43 = vld [vmem:[#allocation5] sm:$0xff] }
 0x61f   : > { %1188 = vst.msk [vmem:[#allocation5 + $0x10] sm:$0xff] %vm1185_vm2, %v1178_v42  ;;  %v1191_v44 = vld [vmem:[#allocation5 + $0x8] sm:$0xff] }
 0x620   : > { %v2553_v45 = vpack.i.bf16 %v1190_v43, %v1191_v44 }
 0x622   : > { %2554 = vrot.lane.b32.xlu1 %v2553_v45, %s3534_s28 }
 0x626   : > { %v1192_v46 = vld [vmem:[#allocation5 + $0x10] sm:$0xff] }
 0x627   : > { %1329 = vmatpush.msra.mxu3 %v1192_v46  ;;  %v2548_v47 = vpack.i.bf16 %v1192_v46, %v1193_v41 }
 0x629   : > { %2549 = vrot.lane.b32.xlu0 %v2548_v47, %s3534_s28  ;;  %2559 = vrot.lane.b32.xlu2 %v2548_v47, %s2710_s26  ;;  %s2657_s28 = sshra.s32 %s2255_s22, 4  ;;  %s2658_s28 = int_to_ptr.hbm [resolvable:$true] %s2657_s28 }
 0x62a   : > { %1496 = vperm.xlu1 %2536, %v1458_v48   ;;  %1330 = vmatpush.msra.mxu3 %v1191_v44  ;;  %s2659_s23 = scalar_lea.hbm %s2658_s28, 1  ;;  %p2664_p0 = scmp.lt.s32.totalorder %s2658_s28, %s3526_s17 }
 0x62b   : > { %p2660_p11 = scmp.ne.s32.totalorder %s2658_s28, %s2659_s23  ;;  %p2665_p1 = scmp.lt.s32.totalorder %s2663_s0, %s2659_s23 }
 0x62c   : > { %1331 = vmatpush.msra.mxu3 %v1190_v43 }
 0x62d   : > { %2410 = vmatmul.msk.f32.vlgmr.msra.gmra.mxu3 %vm1123_vm0, %v1194_v58  ;;  %p2661_p12 = pnand %p2660_p11, %p2847_p5  ;;  %p2666_p2 = por %p2665_p1, %p2664_p0 }
 0x62f   : > { %p2662_p13 = pneg %p2661_p12 }
 0x631   : > { %1491 = vperm.xlu2 %2537, %v1457_v49   ;;  %2564 = vrot.lane.b32.xlu0 %v2553_v45, %s2710_s26  ;;  %p2667_p3 = pnand %p2666_p2, %p2662_p13 }
 0x632   : > { %1481 = vperm.xlu1 %2536, %v1455_v50  }
 0x635   : > { %2411 = vmatmul.msk.f32.gmra.mxu3 %vm1123_vm0, %v1195_v60 }
 0x639   : > { %1476 = vperm.xlu2 %2537, %v1454_v51   ;;  %1486 = vperm.xlu0 %2535, %v1456_v52  }
 0x63a   : > { %1466 = vperm.xlu1 %2536, %v1452_v53  }
 0x63d   : > { %2412 = vmatmul.msk.f32.gmra.mxu3 %vm1123_vm0, %v1196_v61 }
 0x641   : > { %1461 = vperm.xlu2 %2537, %v1451_v54   ;;  %1471 = vperm.xlu0 %2535, %v1453_v55  }
 0x645   : > { %2413 = vmatmul.msk.f32.gmra.mxu3 %vm1123_vm0, %v1197_v1 }
 0x64d   : > { %2414 = vmatmul.msk.f32.gmra.mxu3 %vm1123_vm0, %v1198_v9 }
 0x655   : > { %2415 = vmatmul.msk.f32.gmra.mxu3 %vm1123_vm0, %v1199_v13 }
 0x65d   : > { %2416 = vmatmul.msk.f32.gmra.mxu3 %vm1123_vm0, %v1200_v16 }
 0x665   : > { %2417 = vmatmul.msk.f32.gmra.mxu3 %vm1123_vm0, %v1201_v19 }
 0x683   : > { %v2560_v56 = vpop.permute.xlu2 %2559 }
 0x684   : > { %v2561_v57 = vunpack.i.l.bf16 %v2560_v56  ;;  %v2562_v59 = vunpack.i.h.bf16 %v2560_v56 }
 0x686   : > { %1414 = vmatpush.msrb.mxu1 %v2561_v57 }
 0x688   : > { %1415 = vmatpush.msrb.mxu1 %v2562_v59 }
 0x694   : > { %v2555_v0 = vpop.permute.xlu1 %2554 }
 0x695   : > { %v2556_v3 = vunpack.i.l.bf16 %v2555_v0  ;;  %v2557_v4 = vunpack.i.h.bf16 %v2555_v0 }
 0x69b   : > { %v2550_v62 = vpop.permute.xlu0 %2549 }
 0x69c   : > { %v2551_v63 = vunpack.i.l.bf16 %v2550_v62  ;;  %v2552_v2 = vunpack.i.h.bf16 %v2550_v62 }
 0x69e   : > { %1263 = vmatpush.msra.mxu2 %v2551_v63 }
 0x6a0   : > { %1264 = vmatpush.msra.mxu2 %v2552_v2 }
 0x6a2   : > { %1265 = vmatpush.msra.mxu2 %v2556_v3 }
 0x6a3   : > { %v2565_v7 = vpop.permute.xlu0 %2564 }
 0x6a4   : > { %v2566_v8 = vunpack.i.l.bf16 %v2565_v7  ;;  %1266 = vmatpush.msra.mxu2 %v2557_v4  ;;  %v2567_v10 = vunpack.i.h.bf16 %v2565_v7 }
 0x6a5   : > { %2402 = vmatmul.msk.f32.vlgmr.msra.gmra.mxu2 %vm1123_vm0, %v2394_v6 }
 0x6a6   : > { %1416 = vmatpush.msrb.mxu1 %v2566_v8 }
 0x6a8   : > { %1417 = vmatpush.msrb.mxu1 %v2567_v10 }
 0x6a9   : > { %2426 = vmatmul.msk.f32.vlgmr.msrb.gmra.mxu1 %vm1123_vm0, %v2418_v11 }
 0x6ab   : > { %v1487_v11 = vpop.permute.xlu0 %1486 }
 0x6ad   : > { %2403 = vmatmul.msk.f32.gmra.mxu2 %vm1123_vm0, %v2395_v12 }
 0x6b0   : > { %v1333_v29 = vpop.f32.mrf.mxu3 }
 0x6b1   : > { %2427 = vmatmul.msk.f32.gmra.mxu1 %vm1123_vm0, %v2419_v14  ;;  %v1492_v14 = vpop.permute.xlu2 %1491 }
 0x6b3   : > { %v1472_v16 = vpop.permute.xlu0 %1471 }
 0x6b5   : > { %2404 = vmatmul.msk.f32.gmra.mxu2 %vm1123_vm0, %v2396_v15 }
 0x6b8   : > { %v1336_v30 = vpop.f32.mrf.mxu3 }
 0x6b9   : > { %2428 = vmatmul.msk.f32.gmra.mxu1 %vm1123_vm0, %v2420_v17 }
 0x6bd   : > { %2405 = vmatmul.msk.f32.gmra.mxu2 %vm1123_vm0, %v2397_v18 }
 0x6c0   : > { %v1339_v35 = vpop.f32.mrf.mxu3 }
 0x6c1   : > { %2429 = vmatmul.msk.f32.gmra.mxu1 %vm1123_vm0, %v2421_v20  ;;  %v1497_v20 = vpop.permute.xlu1 %1496 }
 0x6c5   : > { %2406 = vmatmul.msk.f32.gmra.mxu2 %vm1123_vm0, %v2398_v21 }
 0x6c8   : > { %v1342_v41 = vpop.f32.mrf.mxu3 }
 0x6c9   : > { %2430 = vmatmul.msk.f32.gmra.mxu1 %vm1123_vm0, %v2422_v22 }
 0x6cd   : > { %2407 = vmatmul.msk.f32.gmra.mxu2 %vm1123_vm0, %v2399_v23  ;;  %v1477_v23 = vpop.permute.xlu2 %1476 }
 0x6d0   : > { %v1345_v47 = vpop.f32.mrf.mxu3 }
 0x6d1   : > { %2431 = vmatmul.msk.f32.gmra.mxu1 %vm1123_vm0, %v2423_v24 }
 0x6d5   : > { %2408 = vmatmul.msk.f32.gmra.mxu2 %vm1123_vm0, %v2400_v25 }
 0x6d8   : > { %v1348_v53 = vpop.f32.mrf.mxu3 }
 0x6d9   : > { %2432 = vmatmul.msk.f32.gmra.mxu1 %vm1123_vm0, %v2424_v26 }
 0x6dd   : > { %2409 = vmatmul.msk.f32.gmra.mxu2 %vm1123_vm0, %v2401_v27 }
 0x6e0   : > { %v1351_v59 = vpop.f32.mrf.mxu3 }
 0x6e1   : > { %2433 = vmatmul.msk.f32.gmra.mxu1 %vm1123_vm0, %v2425_v28 }
 0x6e8   : > { %v1354_v0 = vpop.f32.mrf.mxu3 }
 0x726   : > { %v1419_v31 = vpop.f32.mrf.mxu1 }
 0x728   : > { %v1268_v32 = vpop.f32.mrf.mxu2 }
 0x729   : > { %v1334_v33 = vadd.f32 %v1333_v29, %v1268_v32  ;;  %v1482_v29 = vpop.permute.xlu1 %1481 }
 0x72b   : > { %v1443_v34 = vadd.f32 %v1419_v31, %v1334_v33 }
 0x72d   : > { %2436 = vmatmul.msk.f32.vlgmr.msra.gmra.mxu0 %vm960_vm15, %v1443_v34 }
 0x72e   : > { %v1422_v36 = vpop.f32.mrf.mxu1 }
 0x730   : > { %v1271_v37 = vpop.f32.mrf.mxu2 }
 0x731   : > { %v1337_v38 = vadd.f32 %v1336_v30, %v1271_v37  ;;  %v1462_v30 = vpop.permute.xlu2 %1461 }
 0x733   : > { %v1444_v39 = vadd.f32 %v1422_v36, %v1337_v38 }
 0x735   : > { %2437 = vmatmul.msk.f32.gmra.mxu0 %vm960_vm15, %v1444_v39 }
 0x736   : > { %v1425_v40 = vpop.f32.mrf.mxu1 }
 0x738   : > { %v1274_v42 = vpop.f32.mrf.mxu2 }
 0x739   : > { %v1340_v43 = vadd.f32 %v1339_v35, %v1274_v42  ;;  %v1467_v35 = vpop.permute.xlu1 %1466 }
 0x73b   : > { %v1445_v44 = vadd.f32 %v1425_v40, %v1340_v43 }
 0x73d   : > { %2438 = vmatmul.msk.f32.gmra.mxu0 %vm960_vm15, %v1445_v44 }
 0x73e   : > { %v1428_v45 = vpop.f32.mrf.mxu1 }
 0x740   : > { %v1277_v46 = vpop.f32.mrf.mxu2 }
 0x741   : > { %v1343_v48 = vadd.f32 %v1342_v41, %v1277_v46 }
 0x743   : > { %v1446_v49 = vadd.f32 %v1428_v45, %v1343_v48 }
 0x745   : > { %2439 = vmatmul.msk.f32.gmra.mxu0 %vm960_vm15, %v1446_v49 }
 0x746   : > { %v1431_v50 = vpop.f32.mrf.mxu1 }
 0x748   : > { %v1280_v51 = vpop.f32.mrf.mxu2 }
 0x749   : > { %v1346_v52 = vadd.f32 %v1345_v47, %v1280_v51 }
 0x74b   : > { %v1447_v54 = vadd.f32 %v1431_v50, %v1346_v52 }
 0x74d   : > { %2440 = vmatmul.msk.f32.gmra.mxu0 %vm960_vm15, %v1447_v54 }
 0x74e   : > { %v1434_v55 = vpop.f32.mrf.mxu1 }
 0x750   : > { %v1283_v56 = vpop.f32.mrf.mxu2 }
 0x751   : > { %v1349_v57 = vadd.f32 %v1348_v53, %v1283_v56  ;;  %v1821_v56 = vld [vmem:[%s3519_s10 + $0x18] sm:$0xff] }
 0x753   : > { %v1448_v58 = vadd.f32 %v1434_v55, %v1349_v57 }
 0x755   : > { %2441 = vmatmul.msk.f32.gmra.mxu0 %vm960_vm15, %v1448_v58  ;;  %v1820_v58 = vld [vmem:[%s3519_s10 + $0x10] sm:$0xff] }
 0x756   : > { %v1437_v60 = vpop.f32.mrf.mxu1 }
 0x758   : > { %v1286_v61 = vpop.f32.mrf.mxu2 }
 0x759   : > { %v1352_v62 = vadd.f32 %v1351_v59, %v1286_v61  ;;  %v1818_v59 = vld [vmem:[%s3519_s10] sm:$0xff] }
 0x75b   : > { %v1449_v63 = vadd.f32 %v1437_v60, %v1352_v62  ;;  %v1819_v60 = vld [vmem:[%s3519_s10 + $0x8] sm:$0xff] }
 0x75d   : > { %2442 = vmatmul.msk.f32.gmra.mxu0 %vm960_vm15, %v1449_v63 }
 0x75e   : > { %v1440_v2 = vpop.f32.mrf.mxu1 }
 0x760   : > { %v1289_v1 = vpop.f32.mrf.mxu2 }
 0x761   : > { %v1355_v3 = vadd.f32 %v1354_v0, %v1289_v1 }
 0x763   : > { %v1450_v4 = vadd.f32 %v1440_v2, %v1355_v3  ;;  %v1621_v3 = vld [vmem:[%s3518_s9] sm:$0xff] }
 0x765   : > { %2443 = vmatmul.msk.f32.gmra.mxu0 %vm960_vm15, %v1450_v4  ;;  %v1622_v4 = vld [vmem:[%s3518_s9 + $0x8] sm:$0xff] }
 0x7aa   : > { %v1540_v6 = vpop.f32.mrf.mxu0 }
 0x7ab   : > { %v1541_v31 = vadd.f32 %v1540_v6, %v1462_v30  ;;  %v2457_v30 = vld [vmem:[%s3518_s9 + $0x48] sm:$0xff] }
 0x7ad   : > { %v1564_v33 = vmax.f32 %v1541_v31, 0.0  ;;  %v2447_v31 = vld [vmem:[%s3518_s9 + $0x38] sm:$0xff] }
 0x7b2   : > { %v1543_v7 = vpop.f32.mrf.mxu0 }
 0x7b3   : > { %v1544_v36 = vadd.f32 %v1543_v7, %v1467_v35  ;;  %v1623_v7 = vld [vmem:[%s3518_s9 + $0x10] sm:$0xff] }
 0x7b5   : > { %v1565_v37 = vmax.f32 %v1544_v36, 0.0 }
 0x7ba   : > { %v1546_v8 = vpop.f32.mrf.mxu0 }
 0x7bb   : > { %v1547_v17 = vadd.f32 %v1546_v8, %v1472_v16 }
 0x7bd   : > { %v1566_v21 = vmax.f32 %v1547_v17, 0.0  ;;  %v1624_v17 = vld [vmem:[%s3518_s9 + $0x18] sm:$0xff] }
 0x7c2   : > { %v1549_v9 = vpop.f32.mrf.mxu0 }
 0x7c3   : > { %v1550_v24 = vadd.f32 %v1549_v9, %v1477_v23  ;;  %v2444_v23 = vld [vmem:[%s3518_s9 + $0x20] sm:$0xff] }
 0x7c5   : > { %v1567_v27 = vmax.f32 %v1550_v24, 0.0 }
 0x7ca   : > { %v1552_v10 = vpop.f32.mrf.mxu0 }
 0x7cb   : > { %v1553_v32 = vadd.f32 %v1552_v10, %v1482_v29  ;;  %v2446_v29 = vld [vmem:[%s3518_s9 + $0x30] sm:$0xff] }
 0x7cd   : > { %v1568_v34 = vmax.f32 %v1553_v32, 0.0  ;;  %v2458_v32 = vld [vmem:[%s3518_s9 + $0x50] sm:$0xff] }
 0x7d2   : > { %v1555_v12 = vpop.f32.mrf.mxu0 }
 0x7d3   : > { %v1556_v13 = vadd.f32 %v1555_v12, %v1487_v11 }
 0x7d5   : > { %v1569_v15 = vmax.f32 %v1556_v13, 0.0 }
 0x7d7   : > { %1590 = vrot.lane.b32.xlu2 %v1569_v15, %s2715_s18 }
 0x7da   : > { %v1558_v18 = vpop.f32.mrf.mxu0 }
 0x7db   : > { %v1559_v19 = vadd.f32 %v1558_v18, %v1492_v14 }
 0x7dd   : > { %v1570_v22 = vmax.f32 %v1559_v19, 0.0 }
 0x7df   : > { %1592 = vrot.lane.b32.xlu1 %v1570_v22, %s2715_s18  ;;  %1584 = vrot.lane.b32.xlu2 %v1566_v21, %s2715_s18 }
 0x7e2   : > { %v1561_v25 = vpop.f32.mrf.mxu0 }
 0x7e3   : > { %v1562_v26 = vadd.f32 %v1561_v25, %v1497_v20 }
 0x7e5   : > { %v1571_v28 = vmax.f32 %v1562_v26, 0.0 }
 0x7e7   : > { %1594 = vrot.lane.b32.xlu0 %v1571_v28, %s2715_s18  ;;  %1586 = vrot.lane.b32.xlu1 %v1567_v27, %s2715_s18  ;;  %v2445_v27 = vld [vmem:[%s3518_s9 + $0x28] sm:$0xff]  ;;  %v2456_v28 = vld [vmem:[%s3518_s9 + $0x40] sm:$0xff] }
 0x7ef   : > { %1588 = vrot.lane.b32.xlu0 %v1568_v34, %s2715_s18  ;;  %1580 = vrot.lane.b32.xlu1 %v1564_v33, %s2715_s18  ;;  %v2459_v33 = vld [vmem:[%s3518_s9 + $0x58] sm:$0xff] }
 0x7f7   : > { %1582 = vrot.lane.b32.xlu0 %v1565_v37, %s2715_s18 }
 0x831   : > { %v1591_v5 = vpop.permute.xlu2 %1590 }
 0x832   : > { %1610 = vst.msk [vmem:[#allocation6 + $0x28] sm:$0xff] %vm1604_vm4, %v1591_v5 }
 0x839   : > { %v1585_v38 = vpop.permute.xlu2 %1584  ;;  %v1618_v50 = vld [vmem:[#allocation6 + $0x28] sm:$0xff] }
 0x83a   : > { %1607 = vst.msk [vmem:[#allocation6 + $0x10] sm:$0xff] %vm1604_vm4, %v1585_v38 }
 0x841   : > { %v1615_v47 = vld [vmem:[#allocation6 + $0x10] sm:$0xff] }
 0x851   : > { %v1593_v39 = vpop.permute.xlu1 %1592 }
 0x852   : > { %1611 = vst.msk [vmem:[#allocation6 + $0x30] sm:$0xff] %vm1604_vm4, %v1593_v39 }
 0x859   : > { %v1595_v40 = vpop.permute.xlu0 %1594  ;;  %v1587_v41 = vpop.permute.xlu1 %1586  ;;  %v1619_v45 = vld [vmem:[#allocation6 + $0x30] sm:$0xff] }
 0x85a   : > { %1612 = vst.msk [vmem:[#allocation6 + $0x38] sm:$0xff] %vm1604_vm4, %v1595_v40 }
 0x85b   : > { %1608 = vst.msk [vmem:[#allocation6 + $0x18] sm:$0xff] %vm1604_vm4, %v1587_v41 }
 0x861   : > { %v1589_v42 = vpop.permute.xlu0 %1588  ;;  %v1581_v43 = vpop.permute.xlu1 %1580  ;;  %v1620_v44 = vld [vmem:[#allocation6 + $0x38] sm:$0xff] }
 0x862   : > { %1609 = vst.msk [vmem:[#allocation6 + $0x20] sm:$0xff] %vm1604_vm4, %v1589_v42  ;;  %1723 = vmatpush.msrb.mxu3 %v1620_v44  ;;  %v2588_v46 = vpack.i.bf16 %v1619_v45, %v1620_v44  ;;  %v1616_v48 = vld [vmem:[#allocation6 + $0x18] sm:$0xff] }
 0x863   : > { %1605 = vst.msk [vmem:[#allocation6] sm:$0xff] %vm1604_vm4, %v1581_v43  ;;  %v2568_v49 = vpack.i.bf16 %v1615_v47, %v1616_v48 }
 0x864   : > { %1724 = vmatpush.msrb.mxu3 %v1619_v45  ;;  %2589 = vrot.lane.b32.xlu2 %v2588_v46, %s3550_s1 }
 0x865   : > { %2569 = vrot.lane.b32.xlu1 %v2568_v49, %s3550_s1 }
 0x866   : > { %1725 = vmatpush.msrb.mxu3 %v1618_v50 }
 0x869   : > { %v1583_v51 = vpop.permute.xlu0 %1582  ;;  %v1617_v52 = vld [vmem:[#allocation6 + $0x20] sm:$0xff] }
 0x86a   : > { %1606 = vst.msk [vmem:[#allocation6 + $0x8] sm:$0xff] %vm1604_vm4, %v1583_v51  ;;  %1726 = vmatpush.msrb.mxu3 %v1617_v52  ;;  %v2573_v53 = vpack.i.bf16 %v1617_v52, %v1618_v50  ;;  %v1613_v55 = vld [vmem:[#allocation6] sm:$0xff] }
 0x86c   : > { %1727 = vmatpush.msrb.mxu3 %v1616_v48  ;;  %2594 = vrot.lane.b32.xlu2 %v2588_v46, %s2710_s26 }
 0x86d   : > { %2574 = vrot.lane.b32.xlu0 %v2573_v53, %s3550_s1  ;;  %2584 = vrot.lane.b32.xlu1 %v2573_v53, %s2710_s26 }
 0x86e   : > { %1728 = vmatpush.msrb.mxu3 %v1615_v47 }
 0x871   : > { %v1614_v54 = vld [vmem:[#allocation6 + $0x8] sm:$0xff] }
 0x872   : > { %1729 = vmatpush.msrb.mxu3 %v1614_v54  ;;  %v2578_v57 = vpack.i.bf16 %v1613_v55, %v1614_v54 }
 0x874   : > { %2599 = vrot.lane.b32.xlu2 %v2568_v49, %s2710_s26  ;;  %1730 = vmatpush.msrb.mxu3 %v1613_v55 }
 0x875   : > { %1839 = vperm.xlu1 %2536, %v1821_v56   ;;  %2579 = vrot.lane.b32.xlu0 %v2578_v57, %s3550_s1 }
 0x876   : > { %2452 = vmatmul.msk.f32.vlgmr.msrb.gmra.mxu3 %vm898_vm12, %v1621_v3 }
 0x87c   : > { %1834 = vperm.xlu2 %2537, %v1820_v58  }
 0x87d   : > { %1824 = vperm.xlu1 %2536, %v1818_v59   ;;  %2604 = vrot.lane.b32.xlu0 %v2578_v57, %s2710_s26 }
 0x87e   : > { %2453 = vmatmul.msk.f32.gmra.mxu3 %vm898_vm12, %v1622_v4 }
 0x885   : > { %1829 = vperm.xlu0 %2535, %v1819_v60  }
 0x886   : > { %2454 = vmatmul.msk.f32.gmra.mxu3 %vm898_vm12, %v1623_v7 }
 0x88e   : > { %2455 = vmatmul.msk.f32.gmra.mxu3 %vm898_vm12, %v1624_v17 }
 0x8be   : > { %v2590_v61 = vpop.permute.xlu2 %2589 }
 0x8bf   : > { %v2591_v62 = vunpack.i.l.bf16 %v2590_v61  ;;  %v2592_v63 = vunpack.i.h.bf16 %v2590_v61 }
 0x8c1   : > { %1682 = vmatpush.msrb.mxu2 %v2591_v62 }
 0x8c3   : > { %1683 = vmatpush.msrb.mxu2 %v2592_v63 }
 0x8c6   : > { %v2595_v0 = vpop.permute.xlu2 %2594 }
 0x8c7   : > { %v2596_v1 = vunpack.i.l.bf16 %v2595_v0  ;;  %v2597_v2 = vunpack.i.h.bf16 %v2595_v0 }
 0x8c9   : > { %1793 = vmatpush.msra.mxu1 %v2596_v1 }
 0x8cb   : > { %1794 = vmatpush.msra.mxu1 %v2597_v2 }
 0x8ce   : > { %v2600_v12 = vpop.permute.xlu2 %2599 }
 0x8cf   : > { %v2601_v15 = vunpack.i.l.bf16 %v2600_v12  ;;  %v2602_v18 = vunpack.i.h.bf16 %v2600_v12  ;;  %v1999_v12 = vld [vmem:[%s3521_s12] sm:$0xff] }
 0x8d6   : > { %v1835_v49 = vpop.permute.xlu2 %1834 }
 0x8d7   : > { %v2570_v6 = vpop.permute.xlu1 %2569 }
 0x8d8   : > { %v2571_v16 = vunpack.i.l.bf16 %v2570_v6  ;;  %v2572_v19 = vunpack.i.h.bf16 %v2570_v6 }
 0x8df   : > { %v2575_v8 = vpop.permute.xlu0 %2574  ;;  %v2585_v9 = vpop.permute.xlu1 %2584 }
 0x8e0   : > { %v2576_v10 = vunpack.i.l.bf16 %v2575_v8  ;;  %v2586_v11 = vunpack.i.l.bf16 %v2585_v9  ;;  %v2577_v13 = vunpack.i.h.bf16 %v2575_v8  ;;  %v2587_v14 = vunpack.i.h.bf16 %v2585_v9 }
 0x8e2   : > { %1684 = vmatpush.msrb.mxu2 %v2576_v10  ;;  %1795 = vmatpush.msra.mxu1 %v2586_v11 }
 0x8e4   : > { %1685 = vmatpush.msrb.mxu2 %v2577_v13  ;;  %1796 = vmatpush.msra.mxu1 %v2587_v14  ;;  %v2000_v13 = vld [vmem:[%s3521_s12 + $0x8] sm:$0xff]  ;;  %v1874_v14 = vld [vmem:[%s3520_s11] sm:$0xff] }
 0x8e6   : > { %1686 = vmatpush.msrb.mxu2 %v2571_v16  ;;  %1797 = vmatpush.msra.mxu1 %v2601_v15  ;;  %v1875_v15 = vld [vmem:[%s3520_s11 + $0x8] sm:$0xff] }
 0x8e7   : > { %v2580_v20 = vpop.permute.xlu0 %2579  ;;  %v1840_v53 = vpop.permute.xlu1 %1839 }
 0x8e8   : > { %v2581_v21 = vunpack.i.l.bf16 %v2580_v20  ;;  %1687 = vmatpush.msrb.mxu2 %v2572_v19  ;;  %1798 = vmatpush.msra.mxu1 %v2602_v18  ;;  %v2582_v22 = vunpack.i.h.bf16 %v2580_v20 }
 0x8ea   : > { %1688 = vmatpush.msrb.mxu2 %v2581_v21 }
 0x8ec   : > { %1689 = vmatpush.msrb.mxu2 %v2582_v22 }
 0x8ed   : > { %2448 = vmatmul.msk.f32.vlgmr.msrb.gmra.mxu2 %vm898_vm12, %v2444_v23 }
 0x8ef   : > { %v2605_v24 = vpop.permute.xlu0 %2604  ;;  %v1825_v62 = vpop.permute.xlu1 %1824 }
 0x8f0   : > { %v2606_v25 = vunpack.i.l.bf16 %v2605_v24  ;;  %v2607_v26 = vunpack.i.h.bf16 %v2605_v24 }
 0x8f2   : > { %1799 = vmatpush.msra.mxu1 %v2606_v25  ;;  %v2470_v25 = vld [vmem:[%s3520_s11 + $0x20] sm:$0xff] }
 0x8f4   : > { %1800 = vmatpush.msra.mxu1 %v2607_v26 }
 0x8f5   : > { %2449 = vmatmul.msk.f32.gmra.mxu2 %vm898_vm12, %v2445_v27  ;;  %2460 = vmatmul.msk.f32.vlgmr.msra.gmra.mxu1 %vm898_vm12, %v2456_v28 }
 0x8f7   : > { %v1830_v41 = vpop.permute.xlu0 %1829 }
 0x8f9   : > { %v1732_v34 = vpop.f32.mrf.mxu3 }
 0x8fd   : > { %2450 = vmatmul.msk.f32.gmra.mxu2 %vm898_vm12, %v2446_v29  ;;  %2461 = vmatmul.msk.f32.gmra.mxu1 %vm898_vm12, %v2457_v30  ;;  %v2464_v29 = vld [vmem:[%s3520_s11 + $0x10] sm:$0xff]  ;;  %v2471_v30 = vld [vmem:[%s3520_s11 + $0x28] sm:$0xff] }
 0x901   : > { %v1735_v37 = vpop.f32.mrf.mxu3 }
 0x905   : > { %2451 = vmatmul.msk.f32.gmra.mxu2 %vm898_vm12, %v2447_v31  ;;  %2462 = vmatmul.msk.f32.gmra.mxu1 %vm898_vm12, %v2458_v32  ;;  %v2465_v31 = vld [vmem:[%s3520_s11 + $0x18] sm:$0xff] }
 0x909   : > { %v1738_v42 = vpop.f32.mrf.mxu3 }
 0x90d   : > { %2463 = vmatmul.msk.f32.gmra.mxu1 %vm898_vm12, %v2459_v33 }
 0x911   : > { %v1741_v51 = vpop.f32.mrf.mxu3 }
 0x970   : > { %v1691_v35 = vpop.f32.mrf.mxu2 }
 0x971   : > { %v1733_v57 = vadd.f32 %v1732_v34, %v1691_v35 }
 0x972   : > { %v1802_v36 = vpop.f32.mrf.mxu1 }
 0x973   : > { %v1814_v60 = vadd.f32 %v1802_v36, %v1733_v57  ;;  %v2027_v57 = vld [vmem:[%s3522_s13] sm:$0xff] }
 0x975   : > { %v1842_v63 = vadd.f32 %v1825_v62, %v1814_v60 }
 0x977   : > { %v1846_v0 = vmax.f32 %v1842_v63, 0.0 }
 0x978   : > { %v1694_v5 = vpop.f32.mrf.mxu2 }
 0x979   : > { %v1736_v38 = vadd.f32 %v1735_v37, %v1694_v5 }
 0x97a   : > { %v1805_v39 = vpop.f32.mrf.mxu1 }
 0x97b   : > { %v1815_v40 = vadd.f32 %v1805_v39, %v1736_v38 }
 0x97d   : > { %v1843_v43 = vadd.f32 %v1830_v41, %v1815_v40 }
 0x97f   : > { %v1847_v44 = vmax.f32 %v1843_v43, 0.0 }
 0x980   : > { %v1697_v45 = vpop.f32.mrf.mxu2 }
 0x981   : > { %v1739_v46 = vadd.f32 %v1738_v42, %v1697_v45  ;;  %1856 = vrot.lane.b32.xlu1 %v1847_v44, %s2715_s18 }
 0x982   : > { %v1808_v47 = vpop.f32.mrf.mxu1 }
 0x983   : > { %v1816_v48 = vadd.f32 %v1808_v47, %v1739_v46  ;;  %v2116_v46 = vld [vmem:[%s3523_s14] sm:$0xff] }
 0x985   : > { %v1844_v50 = vadd.f32 %v1835_v49, %v1816_v48 }
 0x987   : > { %v1848_v52 = vmax.f32 %v1844_v50, 0.0 }
 0x988   : > { %v1700_v54 = vpop.f32.mrf.mxu2 }
 0x989   : > { %v1742_v55 = vadd.f32 %v1741_v51, %v1700_v54  ;;  %1858 = vrot.lane.b32.xlu0 %v1848_v52, %s2715_s18 }
 0x98a   : > { %v1811_v56 = vpop.f32.mrf.mxu1 }
 0x98b   : > { %v1817_v58 = vadd.f32 %v1811_v56, %v1742_v55  ;;  %v2474_v56 = vld [vmem:[%s3522_s13 + $0x8] sm:$0xff] }
 0x98d   : > { %v1845_v59 = vadd.f32 %v1840_v53, %v1817_v58 }
 0x98f   : > { %v1849_v61 = vmax.f32 %v1845_v59, 0.0 }
 0x991   : > { %1860 = vrot.lane.b32.xlu2 %v1849_v61, %s2715_s18  ;;  %v2477_v61 = vld [vmem:[%s3522_s13 + $0x10] sm:$0xff] }
 0x999   : > { %1854 = vrot.lane.b32.xlu2 %v1846_v0, %s2715_s18 }
 0x9eb   : > { %v1861_v1 = vpop.permute.xlu2 %1860 }
 0x9ec   : > { %1869 = vst.msk [vmem:[#allocation7 + $0x18] sm:$0xff] %vm1604_vm4, %v1861_v1 }
 0x9f3   : > { %v1857_v2 = vpop.permute.xlu1 %1856  ;;  %v1855_v3 = vpop.permute.xlu2 %1854  ;;  %v1873_v4 = vld [vmem:[#allocation7 + $0x18] sm:$0xff] }
 0x9f4   : > { %1867 = vst.msk [vmem:[#allocation7 + $0x8] sm:$0xff] %vm1604_vm4, %v1857_v2  ;;  %1942 = vmatpush.msra.mxu2 %v1873_v4 }
 0x9f5   : > { %1866 = vst.msk [vmem:[#allocation7] sm:$0xff] %vm1604_vm4, %v1855_v3 }
 0x9fb   : > { %v1859_v6 = vpop.permute.xlu0 %1858  ;;  %v1871_v7 = vld [vmem:[#allocation7 + $0x8] sm:$0xff] }
 0x9fc   : > { %1868 = vst.msk [vmem:[#allocation7 + $0x10] sm:$0xff] %vm1604_vm4, %v1859_v6  ;;  %v1870_v8 = vld [vmem:[#allocation7] sm:$0xff] }
 0x9fd   : > { %v2618_v9 = vpack.i.bf16 %v1870_v8, %v1871_v7 }
 0x9ff   : > { %2619 = vrot.lane.b32.xlu2 %v2618_v9, %s2710_s26 }
 0xa03   : > { %v1872_v10 = vld [vmem:[#allocation7 + $0x10] sm:$0xff] }
 0xa04   : > { %1943 = vmatpush.msra.mxu2 %v1872_v10  ;;  %v2613_v11 = vpack.i.bf16 %v1872_v10, %v1873_v4  ;;  %v2130_v10 = vld [vmem:[%s3524_s15] sm:$0x1] }
 0xa06   : > { %2614 = vrot.lane.b32.xlu1 %v2613_v11, %s3550_s1  ;;  %2609 = vrot.lane.b32.xlu0 %v2613_v11, %s2710_s26  ;;  %v2479_v11 = vld [vmem:[%s3524_s15 + $0x1] sm:$0x1] }
 0xa07   : > { %1944 = vmatpush.msra.mxu2 %v1871_v7  ;;  %2003 = vperm.xlu2 %2537, %v1999_v12   ;;  %v2212_v7 = vld [vmem:[#allocation10] sm:$0x1]  ;;  %v2482_v12 = vld [vmem:[%s3524_s15 + $0x2] sm:$0x1] }
 0xa09   : > { %1945 = vmatpush.msra.mxu2 %v1870_v8 }
 0xa0a   : > { %2468 = vmatmul.msk.f32.vlgmr.msra.gmra.mxu2 %vm1123_vm0, %v1874_v14 }
 0xa0e   : > { %2008 = vperm.xlu1 %2536, %v2000_v13   ;;  %2624 = vrot.lane.b32.xlu0 %v2618_v9, %s3550_s1 }
 0xa12   : > { %2469 = vmatmul.msk.f32.gmra.mxu2 %vm1123_vm0, %v1875_v15 }
 0xa59   : > { %v2620_v20 = vpop.permute.xlu2 %2619 }
 0xa5a   : > { %v2621_v23 = vunpack.i.l.bf16 %v2620_v20  ;;  %v2622_v24 = vunpack.i.h.bf16 %v2620_v20 }
 0xa61   : > { %v2004_v37 = vpop.permute.xlu2 %2003 }
 0xa78   : > { %v2615_v16 = vpop.permute.xlu1 %2614  ;;  %v2610_v17 = vpop.permute.xlu0 %2609 }
 0xa79   : > { %v2616_v18 = vunpack.i.l.bf16 %v2615_v16  ;;  %v2611_v19 = vunpack.i.l.bf16 %v2610_v17  ;;  %v2617_v21 = vunpack.i.h.bf16 %v2615_v16  ;;  %v2612_v22 = vunpack.i.h.bf16 %v2610_v17 }
 0xa7b   : > { %1913 = vmatpush.msrb.mxu0 %v2616_v18  ;;  %1986 = vmatpush.msra.mxu3 %v2611_v19 }
 0xa7d   : > { %1914 = vmatpush.msrb.mxu0 %v2617_v21  ;;  %1987 = vmatpush.msra.mxu3 %v2612_v22 }
 0xa7f   : > { %1988 = vmatpush.msra.mxu3 %v2621_v23 }
 0xa80   : > { %v2625_v26 = vpop.permute.xlu0 %2624  ;;  %v2009_v44 = vpop.permute.xlu1 %2008 }
 0xa81   : > { %v2626_v27 = vunpack.i.l.bf16 %v2625_v26  ;;  %1989 = vmatpush.msra.mxu3 %v2622_v24  ;;  %v2627_v28 = vunpack.i.h.bf16 %v2625_v26 }
 0xa82   : > { %2472 = vmatmul.msk.f32.vlgmr.msra.gmra.mxu3 %vm1123_vm0, %v2470_v25 }
 0xa83   : > { %1915 = vmatpush.msrb.mxu0 %v2626_v27 }
 0xa85   : > { %1916 = vmatpush.msrb.mxu0 %v2627_v28 }
 0xa86   : > { %2466 = vmatmul.msk.f32.vlgmr.msrb.gmra.mxu0 %vm1123_vm0, %v2464_v29 }
 0xa8a   : > { %2473 = vmatmul.msk.f32.gmra.mxu3 %vm1123_vm0, %v2471_v30 }
 0xa8d   : > { %v1947_v32 = vpop.f32.mrf.mxu2 }
 0xa8e   : > { %2467 = vmatmul.msk.f32.gmra.mxu0 %vm1123_vm0, %v2465_v31 }
 0xa95   : > { %v1950_v38 = vpop.f32.mrf.mxu2 }
 0xb03   : > { %v1918_v33 = vpop.f32.mrf.mxu0 }
 0xb04   : > { %v1948_v34 = vadd.f32 %v1947_v32, %v1918_v33 }
 0xb05   : > { %v1991_v35 = vpop.f32.mrf.mxu3 }
 0xb06   : > { %v1997_v36 = vadd.f32 %v1991_v35, %v1948_v34 }
 0xb08   : > { %v2011_v5 = vadd.f32 %v2004_v37, %v1997_v36 }
 0xb0a   : > { %v2013_v39 = vmax.f32 %v2011_v5, 0.0 }
 0xb0b   : > { %v1921_v40 = vpop.f32.mrf.mxu0 }
 0xb0c   : > { %v1951_v41 = vadd.f32 %v1950_v38, %v1921_v40  ;;  %2017 = vrot.lane.b32.xlu1 %v2013_v39, %s2715_s18 }
 0xb0d   : > { %v1994_v42 = vpop.f32.mrf.mxu3 }
 0xb0e   : > { %v1998_v43 = vadd.f32 %v1994_v42, %v1951_v41 }
 0xb10   : > { %v2012_v45 = vadd.f32 %v2009_v44, %v1998_v43 }
 0xb12   : > { %v2014_v47 = vmax.f32 %v2012_v45, 0.0 }
 0xb14   : > { %2019 = vrot.lane.b32.xlu0 %v2014_v47, %s2715_s18  ;;  %2119 = vperm.xlu1 %2536, %v2116_v46  }
 0xb7e   : > { %v2018_v48 = vpop.permute.xlu1 %2017 }
 0xb7f   : > { %2023 = vst.msk [vmem:[#allocation8] sm:$0xff] %vm1604_vm4, %v2018_v48 }
 0xb86   : > { %v2020_v49 = vpop.permute.xlu0 %2019  ;;  %v2025_v50 = vld [vmem:[#allocation8] sm:$0xff]  ;;  %v2120_v3 = vpop.permute.xlu1 %2119 }
 0xb87   : > { %2024 = vst.msk [vmem:[#allocation8 + $0x8] sm:$0xff] %vm1604_vm4, %v2020_v49 }
 0xb8e   : > { %v2026_v51 = vld [vmem:[#allocation8 + $0x8] sm:$0xff] }
 0xb8f   : > { %v2633_v52 = vpack.i.bf16 %v2025_v50, %v2026_v51 }
 0xb91   : > { %2634 = vrot.lane.b32.xlu0 %v2633_v52, %s2710_s26  ;;  %2629 = vrot.lane.b32.xlu2 %v2633_v52, %s3550_s1 }
 0xbeb   : > { %v2630_v53 = vpop.permute.xlu2 %2629 }
 0xbec   : > { %v2631_v54 = vunpack.i.l.bf16 %v2630_v53  ;;  %v2632_v55 = vunpack.i.h.bf16 %v2630_v53 }
 0xbee   : > { %2055 = vmatpush.msra.mxu0 %v2631_v54 }
 0xbf0   : > { %2056 = vmatpush.msra.mxu0 %v2632_v55 }
 0xbf1   : > { %2475 = vmatmul.msk.f32.vlgmr.msra.gmra.mxu0 %vm960_vm15, %v2474_v56 }
 0xbf2   : > { %2078 = vmatpush.msrb.mxu0 %v2026_v51 }
 0xbf4   : > { %2079 = vmatpush.msrb.mxu0 %v2025_v50 }
 0xbf9   : > { %2476 = vmatmul.msk.f32.vlgmr.msrb.gmra.mxu0 %vm960_vm15, %v2027_v57 }
 0xc03   : > { %v2635_v58 = vpop.permute.xlu0 %2634 }
 0xc04   : > { %v2636_v59 = vunpack.i.l.bf16 %v2635_v58  ;;  %v2637_v60 = vunpack.i.h.bf16 %v2635_v58 }
 0xc06   : > { %2109 = vmatpush.msrb.mxu1 %v2636_v59 }
 0xc08   : > { %2110 = vmatpush.msrb.mxu1 %v2637_v60 }
 0xc09   : > { %2478 = vmatmul.msk.f32.vlgmr.msrb.gmra.mxu1 %vm960_vm15, %v2477_v61 }
 0xc6e   : > { %v2058_v62 = vpop.f32.mrf.mxu0 }
 0xc76   : > { %v2081_v63 = vpop.f32.mrf.mxu0 }
 0xc77   : > { %v2082_v0 = vadd.f32 %v2081_v63, %v2058_v62 }
 0xc86   : > { %v2112_v1 = vpop.f32.mrf.mxu1 }
 0xc87   : > { %v2115_v2 = vadd.f32 %v2112_v1, %v2082_v0 }
 0xc89   : > { %v2122_v4 = vadd.f32 %v2120_v3, %v2115_v2 }
 0xc8b   : > { %v2123_v6 = vmax.f32 %v2122_v4, 0.0 }
 0xc8d   : > { %2125 = vrot.lane.b32.xlu2 %v2123_v6, %s2715_s18 }
 0xc95   : > { %2215 = vperm.xlu2 %2537, %v2212_v7  }
 0xce7   : > { %v2126_v8 = vpop.permute.xlu2 %2125 }
 0xce8   : > { %2128 = vst.msk [vmem:[#allocation9] sm:$0xff] %vm1604_vm4, %v2126_v8 }
 0xcef   : > { %v2129_v9 = vld [vmem:[#allocation9] sm:$0xff]  ;;  %v2216_v16 = vpop.permute.xlu2 %2215 }
 0xcf0   : > { %2185 = vrot.lane.b32.xlu1 %v2129_v9, %s2710_s26  ;;  %2134 = vrot.lane.b32.xlu0 %v2129_v9, %s3550_s1  ;;  %v2218_v20 = vperm.slane %v2216_v16, 0  ;;  %s537_s26 = sand.u32 1, %s2697_s27  }
 0xcf1   : > { %2178 = vmatpush.msrb.mxu3 %v2129_v9  ;;  %s538_s21 = scalar_lea.vmem [#allocation11], %s537_s26  ;;  %s2242_s16 = scalar_lea.sflag [#allocation12], %s537_s26 }
 0xcf2   : > { %2481 = vmatmul.msk.f32.vlgmr.msrb.gmra.mxu3 %vm790_vm11, %v2130_v10  ;;  %s2252_s19 = sshll.u32 %s538_s21, 4  ;;  %s2253_s19 = int_to_ptr.vmem [resolvable:$true] %s2252_s19 }
 0xd62   : > { %v2186_v13 = vpop.permute.xlu1 %2185  ;;  %v2135_v14 = vpop.permute.xlu0 %2134 }
 0xd63   : > { %2155 = vmatpush.msrb.mxu2 %v2135_v14  ;;  %2206 = vmatpush.msra.mxu0 %v2186_v13 }
 0xd64   : > { %2480 = vmatmul.msk.f32.vlgmr.msrb.gmra.mxu2 %vm790_vm11, %v2479_v11  ;;  %2483 = vmatmul.msk.f32.vlgmr.msra.gmra.mxu0 %vm790_vm11, %v2482_v12 }
 0xd75   : > { %v2180_v15 = vpop.f32.mrf.mxu3 }
 0xde1   : > { %v2208_v18 = vpop.f32.mrf.mxu0 }
 0xde7   : > { %v2157_v17 = vpop.f32.mrf.mxu2 }
 0xde8   : > { %v2181_v19 = vadd.f32 %v2180_v15, %v2157_v17 }
 0xdea   : > { %v2211_v21 = vadd.f32 %v2208_v18, %v2181_v19 }
 0xdec   : > { %v2219_v22 = vadd.f32 %v2218_v20, %v2211_v21 }
 0xdee   : > { %v2484_v23 = vmul.f32 -1.442695, %v2219_v22 }
 0xdf0   : > { %2639 = vpow2.f32 %v2484_v23 }
 0xdf6   : > { %v2640_v24 = vpop.eup %2639 }
 0xdf7   : > { %v2223_v25 = vadd.f32 1.0, %v2640_v24 }
 0xdf9   : > { %2641 = vrcp.f32 %v2223_v25  ;;  %v2235_v29 = vand.u32 2147483648, %v2223_v25  ;;  %v2233_v31 = vand.u32 2147483647, %v2223_v25  ;;  %vm2229_vm6 = vweird.f32 %v2223_v25 }
 0xdfb   : > { %v2236_v33 = vor.u32 1.1754944e-38, %v2235_v29  ;;  %vm2234_vm9 = vcmp.eq.f32.partialorder %v2233_v31, 8.507059e+37 }
 0xdff   : > { %v2642_v26 = vpop.eup %2641 }
 0xe00   : > { %v2225_v27 = vmul.f32 %v2642_v26, %v2223_v25  ;;  %vm2230_vm5 = vweird.f32 %v2642_v26 }
 0xe01   : > { %vm2231_vm7 = vmor %vm2229_vm6, %vm2230_vm5 }
 0xe02   : > { %v2226_v28 = vsub.f32 1.0, %v2225_v27 }
 0xe04   : > { %v2227_v30 = vmul.f32 %v2642_v26, %v2226_v28 }
 0xe06   : > { %v2228_v32 = vadd.f32 %v2642_v26, %v2227_v30 }
 0xe08   : > { %v2232_v34 = vsel %vm2231_vm7, %v2642_v26, %v2228_v32 }
 0xe09   : > { %v2237_v35 = vsel %vm2234_vm9, %v2236_v33, %v2232_v34 }
 0xe0a   : > { %2240 = vst.msk [vmem:[%s538_s21] sm:$0x1] %vm2239_vm8, %v2237_v35 }
 0xe0b   : > { %2670 = shalt.err (!%p2667_p3)
}
 0xe0c   : > { %2487 = dma.vmem_to_hbm [thread:$0]  (%p2847_p5), %s2253_s19, 16, %s2255_s22, %s2242_s16  }
 0xe0d PF: > { %s3551_s26 = sld [smem:[#allocation16_spill]] }
 0xe0e   : > { %s3552_s30 = sld [smem:[#allocation14_spill]] }
 0xe13   : > { %p2493_p4 = scmp.ge.s32.totalorder %s3551_s26, 2 }
 0xe14   : > { %s2266_s2 = sand.u32 1, %s3552_s30  }
 0xe15   : > { %p2490_p7 = pnand %p2493_p4, %p2851_p6  ;;  %s2267_s25 = scalar_lea.sflag [#allocation12], %s2266_s2 }
 0xe17   : > { %p2491_p8 = pneg %p2490_p7 }
 0xe19   : > { %2688 = dma.done.wait (%p2491_p8), %s2267_s25, 16  }
 0xe1a   : > { %2690 = vsyncadd (%p2491_p8), %s2267_s25, 4294967280  ;;  %s3554_s29 = sld [smem:[#allocation17_spill]]  ;;  %s3557_s26 = smov %s2697_s27 }
 0xe1b   : > { %s3555_s28 = sld [smem:[#allocation15_spill]] }
 0xe1c   : > { %s3556_s23 = sld [smem:[#allocation18_spill]] }
 0xe20   : > { %p29_p9 = scmp.ge.s32.totalorder %s3554_s29, 4  }
 0xe21   : > { %s3558_s27 = smov %s3555_s28 }
 0xe22   : > { %s3559_s28 = smov %s3556_s23  ;;  %31 = sbr.rel (!%p29_p9) target bundleno = 7 (0x7), region = 141 }
 0xe27   :  { %2272 = vsyncpa [#allocation12], 1 }
 0xe28   :  { %2274 = vsyncpa [#allocation12 + $0x1], 1 }

</bundles_post_ra>
